<compile_context>
chip_gen: v5e
topology: v5e:2x2
jax: 0.10.0
libtpu: 0.0.40
codegen_flags: <defaults>
</compile_context>

<pallas_src>
import functools

import jax
import jax.numpy as jnp
import numpy as np
from jax.experimental import pallas as pl
from jax.experimental.pallas import tpu as pltpu

WIN = 11                       # SSIM Gaussian window size
SIGMA = 1.5                    # SSIM Gaussian sigma
DATA_RANGE = 2.0               # images in [-1, 1]
C1 = (0.01 * DATA_RANGE) ** 2
C2 = (0.03 * DATA_RANGE) ** 2
COS_THRESHOLD = 0.8
RECONSTRUCTION_WEIGHT = 4.0    # stand-in for config 'training.losses/reconstruction_weight'

# VMEM budget for the double-buffered image pipeline (safe for v7x 64 MiB).
_VMEM_IMG_BUDGET = 12 << 20
_VMEM_LIMIT = 32 << 20


def _gaussian_1d(size=WIN, sigma=SIGMA):
    coords = np.arange(size, dtype=np.float64) - (size - 1) / 2.0
    g = np.exp(-(coords ** 2) / (2.0 * sigma ** 2))
    return (g / g.sum()).astype(np.float32)


def _band_matrix(n, size=WIN):
    """(n - size + 1, n) 'valid' 1-D Gaussian filter as a matmul operand."""
    g = _gaussian_1d(size)
    nc = n - size + 1
    m = np.zeros((nc, n), dtype=np.float32)
    for i in range(nc):
        m[i, i:i + size] = g
    return m


def _blur_matrix(h, w):
    """(H*W, Hc*Wc) dense 'valid' 2-D Gaussian-window matrix: vec(z) @ G = vec(blur(z))."""
    ah = _band_matrix(h)          # (Hc, H)
    awt = _band_matrix(w).T       # (W, Wc)
    hc, wc = ah.shape[0], awt.shape[1]
    g = np.einsum('ph,wq->hwpq', ah, awt).reshape(h * w, hc * wc)
    return g.astype(np.float32), hc, wc


def _pick_tb(b, c, hw, budget_bytes=_VMEM_IMG_BUDGET):
    """Samples per grid step: 3 f32 image tensors x 2 pipeline buffers <= budget."""
    per_sample = 3 * c * hw * 4
    tb = max(1, budget_bytes // (2 * per_sample))
    return int(min(tb, b, 64))


def _loss_kernel(src_ref, tgt_ref, gen_ref, memb_ref, gblk_ref, out_ref, *,
                 inv_n_pix, inv_n_blur):
    # Each ref is read exactly once; all math is on lane-dense (TB, C*H*W) values.
    src = src_ref[...].astype(jnp.float32)    # (TB, C*H*W)
    tgt = tgt_ref[...].astype(jnp.float32)
    gen = gen_ref[...].astype(jnp.float32)

    # --- per-sample MSE(source, target) ------------------------------------
    d = src - tgt
    mse = jnp.sum(d * d, axis=1, keepdims=True) * inv_n_pix          # (TB, 1)

    # --- synthetic embedder (GAP + linear fused into one matmul) -----------
    memb = memb_ref[...]                                             # (C*H*W, E)
    emb_s = jnp.dot(src, memb, preferred_element_type=jnp.float32)   # (TB, E)
    emb_t = jnp.dot(tgt, memb, preferred_element_type=jnp.float32)
    num = jnp.sum(emb_s * emb_t, axis=1, keepdims=True)
    den = jnp.sqrt(jnp.sum(emb_s * emb_s, axis=1, keepdims=True)) * \
          jnp.sqrt(jnp.sum(emb_t * emb_t, axis=1, keepdims=True))
    cos = num / jnp.maximum(den, 1e-8)
    mask = (cos > COS_THRESHOLD).astype(jnp.float32)                 # (TB, 1)

    # --- per-sample SSIM(output, target) ------------------------------------
    # All TB*C per-channel 11x11 Gaussian blurs of one map type in ONE matmul
    # against the block-diagonal window matrix gblk: (C*H*W, C*Hc*Wc).
    gblk = gblk_ref[...]
    x, y = gen, tgt
    mu_x = jnp.dot(x, gblk, preferred_element_type=jnp.float32)      # (TB, C*Hc*Wc)
    mu_y = jnp.dot(y, gblk, preferred_element_type=jnp.float32)
    e_xx = jnp.dot(x * x, gblk, preferred_element_type=jnp.float32)
    e_yy = jnp.dot(y * y, gblk, preferred_element_type=jnp.float32)
    e_xy = jnp.dot(x * y, gblk, preferred_element_type=jnp.float32)
    sxx = e_xx - mu_x * mu_x
    syy = e_yy - mu_y * mu_y
    sxy = e_xy - mu_x * mu_y
    smap = ((2.0 * mu_x * mu_y + C1) * (2.0 * sxy + C2)) / (
        (mu_x * mu_x + mu_y * mu_y + C1) * (sxx + syy + C2))
    ssim_b = jnp.sum(smap, axis=1, keepdims=True) * inv_n_blur       # (TB, 1)

    # Per-sample partials; batch reduction happens in the wrapper.
    out_ref[...] = jnp.concatenate([mse * mask, (1.0 - ssim_b) * mask], axis=1)


@functools.partial(jax.jit, static_argnames=("weight",))
def reconstruction_loss(source, target, output, w_embed,
                        weight=RECONSTRUCTION_WEIGHT):
    b, c, h, w = source.shape
    e = w_embed.shape[0]
    hw = h * w
    chw = c * hw

    g_np, hc, wc = _blur_matrix(h, w)
    gblk = jnp.asarray(np.kron(np.eye(c, dtype=np.float32), g_np))   # (C*H*W, C*Hc*Wc)
    # Fused GAP + linear: emb = x_flat @ memb, memb[c*HW + j, e] = W[e, c] / HW.
    memb = jnp.repeat(w_embed.T.astype(jnp.float32), hw, axis=0) * (1.0 / float(hw))

    tb = _pick_tb(b, c, hw)
    nblk = -(-b // tb)
    b_pad = nblk * tb

    def prep(x):
        x = x.astype(jnp.float32).reshape(b, chw)
        if b_pad != b:
            # Zero-padded samples get mask == 0, so they contribute nothing.
            x = jnp.pad(x, ((0, b_pad - b), (0, 0)))
        return x.reshape(nblk, tb, chw)

    src3, tgt3, gen3 = prep(source), prep(target), prep(output)

    kernel = functools.partial(
        _loss_kernel,
        inv_n_pix=1.0 / float(chw),
        inv_n_blur=1.0 / float(c * hc * wc))

    img_spec = pl.BlockSpec((None, tb, chw), lambda i: (i, 0, 0))

    parts = pl.pallas_call(
        kernel,
        out_shape=jax.ShapeDtypeStruct((nblk, tb, 2), jnp.float32),
        grid=(nblk,),
        in_specs=[img_spec, img_spec, img_spec,
                  pl.BlockSpec((chw, e), lambda i: (0, 0)),
                  pl.BlockSpec((chw, c * hc * wc), lambda i: (0, 0))],
        out_specs=pl.BlockSpec((None, tb, 2), lambda i: (i, 0, 0)),
        compiler_params=pltpu.CompilerParams(
            dimension_semantics=("parallel",),
            vmem_limit_bytes=_VMEM_LIMIT),
    )(src3, tgt3, gen3, memb, gblk)

    parts = parts.reshape(b_pad, 2)
    rec = jnp.sum(parts[:, 0]) * (0.5 / b)     # mean over batch, then * 0.5
    vis = jnp.sum(parts[:, 1]) * (1.0 / b)     # mean over batch
    total = (rec + vis) * 0.5
    return total, total * weight


def reference_loss(source, target, output, w_embed, weight=RECONSTRUCTION_WEIGHT):
    """Pure-JAX reference mirroring the PyTorch forward semantics."""
    b, c, h, w = source.shape
    pooled_s = source.mean(axis=(2, 3))                 # (B, C)
    pooled_t = target.mean(axis=(2, 3))
    es = pooled_s @ w_embed.T                           # (B, E)
    et = pooled_t @ w_embed.T
    num = jnp.sum(es * et, axis=1)
    den = jnp.sqrt(jnp.sum(es * es, axis=1)) * jnp.sqrt(jnp.sum(et * et, axis=1))
    cos = num / jnp.maximum(den, 1e-8)
    mask = (cos > COS_THRESHOLD).astype(jnp.float32)

    mse = jnp.mean((source - target) ** 2, axis=(1, 2, 3))
    rec = jnp.mean(mse * mask) * 0.5

    ah = jnp.asarray(_band_matrix(h))
    awt = jnp.asarray(_band_matrix(w).T)

    def blur(x):
        return jnp.einsum('ph,bchw,wq->bcpq', ah, x, awt)

    mu_x = blur(output)
    mu_y = blur(target)
    sxx = blur(output * output) - mu_x ** 2
    syy = blur(target * target) - mu_y ** 2
    sxy = blur(output * target) - mu_x * mu_y
    smap = ((2 * mu_x * mu_y + C1) * (2 * sxy + C2)) / (
        (mu_x ** 2 + mu_y ** 2 + C1) * (sxx + syy + C2))
    ssim_b = smap.mean(axis=(1, 2, 3))
    vis = jnp.mean((1.0 - ssim_b) * mask)
    total = (rec + vis) * 0.5
    return total, total * weight


if __name__ == "__main__":
    key = jax.random.PRNGKey(0)
    k1, k2, k3, k4 = jax.random.split(key, 4)
    B, C, H, W, E = 2, 3, 16, 16, 32

    # source/target close enough that identity embeddings are similar (mask on).
    source = jax.random.uniform(k1, (B, C, H, W), jnp.float32, -1.0, 1.0)
    target = jnp.clip(source + 0.1 * jax.random.normal(k2, (B, C, H, W), jnp.float32),
                      -1.0, 1.0)
    output = jnp.clip(target + 0.05 * jax.random.normal(k3, (B, C, H, W), jnp.float32),
                      -1.0, 1.0)
    # Deterministic synthetic embedder weights (E, C).
    w_embed = 0.1 * jax.random.normal(k4, (E, C), jnp.float32)

    loss, wloss = reconstruction_loss(source, target, output, w_embed)
    jax.block_until_ready((loss, wloss))

    ref_loss, ref_wloss = reference_loss(source, target, output, w_embed)
    np.testing.assert_allclose(np.asarray(loss), np.asarray(ref_loss),
                               rtol=2e-2, atol=1e-4)
    np.testing.assert_allclose(np.asarray(wloss), np.asarray(ref_wloss),
                               rtol=2e-2, atol=1e-4)
    print("KERNEL_OK")
</pallas_src>

<mosaic_0001>
module attributes {stable_mosaic.version = 11 : i64} {
  func.func @_loss_kernel(%arg0: i32, %arg1: memref<1x2x768xf32, #tpu.memory_space<vmem>>, %arg2: memref<1x2x768xf32, #tpu.memory_space<vmem>>, %arg3: memref<1x2x768xf32, #tpu.memory_space<vmem>>, %arg4: memref<768x32xf32, #tpu.memory_space<vmem>>, %arg5: memref<768x108xf32, #tpu.memory_space<vmem>>, %arg6: memref<1x2x2xf32, #tpu.memory_space<vmem>>) attributes {dimension_semantics = [#tpu.dimension_semantics<parallel>], iteration_bounds = array<i64: 1>, scalar_prefetch = 0 : i64, scratch_operands = 0 : i64, tpu.core_type = #tpu.core_type<tc>, window_params = [{transform_indices = @transform_0, window_bounds = array<i64: 1, 2, 768>}, {transform_indices = @transform_1, window_bounds = array<i64: 1, 2, 768>}, {transform_indices = @transform_2, window_bounds = array<i64: 1, 2, 768>}, {pipeline_mode = #tpu.pipeline_mode<synchronous>, transform_indices = @transform_3, window_bounds = array<i64: 768, 32>}, {pipeline_mode = #tpu.pipeline_mode<synchronous>, transform_indices = @transform_4, window_bounds = array<i64: 768, 108>}, {transform_indices = @transform_5, window_bounds = array<i64: 1, 2, 2>}]} {
    %c0 = arith.constant 0 : index
    %c0_0 = arith.constant 0 : index
    %c0_1 = arith.constant 0 : index
    %0 = vector.load %arg1[%c0, %c0_0, %c0_1] : memref<1x2x768xf32, #tpu.memory_space<vmem>>, vector<1x2x768xf32>
    %1 = vector.shape_cast %0 : vector<1x2x768xf32> to vector<2x768xf32>
    %c0_2 = arith.constant 0 : index
    %c0_3 = arith.constant 0 : index
    %c0_4 = arith.constant 0 : index
    %2 = vector.load %arg2[%c0_2, %c0_3, %c0_4] : memref<1x2x768xf32, #tpu.memory_space<vmem>>, vector<1x2x768xf32>
    %3 = vector.shape_cast %2 : vector<1x2x768xf32> to vector<2x768xf32>
    %c0_5 = arith.constant 0 : index
    %c0_6 = arith.constant 0 : index
    %c0_7 = arith.constant 0 : index
    %4 = vector.load %arg3[%c0_5, %c0_6, %c0_7] : memref<1x2x768xf32, #tpu.memory_space<vmem>>, vector<1x2x768xf32>
    %5 = vector.shape_cast %4 : vector<1x2x768xf32> to vector<2x768xf32>
    %6 = arith.subf %1, %3 : vector<2x768xf32>
    %7 = arith.mulf %6, %6 : vector<2x768xf32>
    %cst = arith.constant dense<0.000000e+00> : vector<2xf32>
    %8 = vector.multi_reduction <add>, %7, %cst [1] : vector<2x768xf32> to vector<2xf32>
    %9 = vector.shape_cast %8 : vector<2xf32> to vector<2x1xf32>
    %cst_8 = arith.constant 0.00130208337 : f32
    %10 = vector.broadcast %cst_8 : f32 to vector<2x1xf32>
    %11 = arith.mulf %9, %10 : vector<2x1xf32>
    %c0_9 = arith.constant 0 : index
    %c0_10 = arith.constant 0 : index
    %12 = vector.load %arg4[%c0_9, %c0_10] : memref<768x32xf32, #tpu.memory_space<vmem>>, vector<768x32xf32>
    %cst_11 = arith.constant dense<0.000000e+00> : vector<2x32xf32>
    %13 = tpu.matmul %1, %12, %cst_11 {dimension_numbers = #tpu.dot_dimension_numbers<[1], [0], [0], [1], [0, 0, 1, 1], [], []>} : vector<2x768xf32>, vector<768x32xf32>, vector<2x32xf32> -> vector<2x32xf32>
    %cst_12 = arith.constant dense<0.000000e+00> : vector<2x32xf32>
    %14 = tpu.matmul %3, %12, %cst_12 {dimension_numbers = #tpu.dot_dimension_numbers<[1], [0], [0], [1], [0, 0, 1, 1], [], []>} : vector<2x768xf32>, vector<768x32xf32>, vector<2x32xf32> -> vector<2x32xf32>
    %15 = arith.mulf %13, %14 : vector<2x32xf32>
    %cst_13 = arith.constant dense<0.000000e+00> : vector<2xf32>
    %16 = vector.multi_reduction <add>, %15, %cst_13 [1] : vector<2x32xf32> to vector<2xf32>
    %17 = vector.shape_cast %16 : vector<2xf32> to vector<2x1xf32>
    %18 = arith.mulf %13, %13 : vector<2x32xf32>
    %cst_14 = arith.constant dense<0.000000e+00> : vector<2xf32>
    %19 = vector.multi_reduction <add>, %18, %cst_14 [1] : vector<2x32xf32> to vector<2xf32>
    %20 = vector.shape_cast %19 : vector<2xf32> to vector<2x1xf32>
    %21 = math.sqrt %20 : vector<2x1xf32>
    %22 = arith.mulf %14, %14 : vector<2x32xf32>
    %cst_15 = arith.constant dense<0.000000e+00> : vector<2xf32>
    %23 = vector.multi_reduction <add>, %22, %cst_15 [1] : vector<2x32xf32> to vector<2xf32>
    %24 = vector.shape_cast %23 : vector<2xf32> to vector<2x1xf32>
    %25 = math.sqrt %24 : vector<2x1xf32>
    %26 = arith.mulf %21, %25 : vector<2x1xf32>
    %cst_16 = arith.constant 9.99999993E-9 : f32
    %27 = vector.broadcast %cst_16 : f32 to vector<2x1xf32>
    %28 = arith.maximumf %26, %27 : vector<2x1xf32>
    %29 = arith.divf %17, %28 : vector<2x1xf32>
    %cst_17 = arith.constant 8.000000e-01 : f32
    %30 = vector.broadcast %cst_17 : f32 to vector<2x1xf32>
    %31 = arith.cmpf ogt, %29, %30 : vector<2x1xf32>
    %32 = arith.extui %31 : vector<2x1xi1> to vector<2x1xi32>
    %33 = arith.sitofp %32 : vector<2x1xi32> to vector<2x1xf32>
    %c0_18 = arith.constant 0 : index
    %c0_19 = arith.constant 0 : index
    %34 = vector.load %arg5[%c0_18, %c0_19] : memref<768x108xf32, #tpu.memory_space<vmem>>, vector<768x108xf32>
    %cst_20 = arith.constant dense<0.000000e+00> : vector<2x108xf32>
    %35 = tpu.matmul %5, %34, %cst_20 {dimension_numbers = #tpu.dot_dimension_numbers<[1], [0], [0], [1], [0, 0, 1, 1], [], []>} : vector<2x768xf32>, vector<768x108xf32>, vector<2x108xf32> -> vector<2x108xf32>
    %cst_21 = arith.constant dense<0.000000e+00> : vector<2x108xf32>
    %36 = tpu.matmul %3, %34, %cst_21 {dimension_numbers = #tpu.dot_dimension_numbers<[1], [0], [0], [1], [0, 0, 1, 1], [], []>} : vector<2x768xf32>, vector<768x108xf32>, vector<2x108xf32> -> vector<2x108xf32>
    %37 = arith.mulf %5, %5 : vector<2x768xf32>
    %cst_22 = arith.constant dense<0.000000e+00> : vector<2x108xf32>
    %38 = tpu.matmul %37, %34, %cst_22 {dimension_numbers = #tpu.dot_dimension_numbers<[1], [0], [0], [1], [0, 0, 1, 1], [], []>} : vector<2x768xf32>, vector<768x108xf32>, vector<2x108xf32> -> vector<2x108xf32>
    %39 = arith.mulf %3, %3 : vector<2x768xf32>
    %cst_23 = arith.constant dense<0.000000e+00> : vector<2x108xf32>
    %40 = tpu.matmul %39, %34, %cst_23 {dimension_numbers = #tpu.dot_dimension_numbers<[1], [0], [0], [1], [0, 0, 1, 1], [], []>} : vector<2x768xf32>, vector<768x108xf32>, vector<2x108xf32> -> vector<2x108xf32>
    %41 = arith.mulf %5, %3 : vector<2x768xf32>
    %cst_24 = arith.constant dense<0.000000e+00> : vector<2x108xf32>
    %42 = tpu.matmul %41, %34, %cst_24 {dimension_numbers = #tpu.dot_dimension_numbers<[1], [0], [0], [1], [0, 0, 1, 1], [], []>} : vector<2x768xf32>, vector<768x108xf32>, vector<2x108xf32> -> vector<2x108xf32>
    %43 = arith.mulf %35, %35 : vector<2x108xf32>
    %44 = arith.subf %38, %43 : vector<2x108xf32>
    %45 = arith.mulf %36, %36 : vector<2x108xf32>
    %46 = arith.subf %40, %45 : vector<2x108xf32>
    %47 = arith.mulf %35, %36 : vector<2x108xf32>
    %48 = arith.subf %42, %47 : vector<2x108xf32>
    %cst_25 = arith.constant 2.000000e+00 : f32
    %49 = vector.broadcast %cst_25 : f32 to vector<2x108xf32>
    %50 = arith.mulf %49, %35 : vector<2x108xf32>
    %51 = arith.mulf %50, %36 : vector<2x108xf32>
    %cst_26 = arith.constant 4.000000e-04 : f32
    %52 = vector.broadcast %cst_26 : f32 to vector<2x108xf32>
    %53 = arith.addf %51, %52 : vector<2x108xf32>
    %cst_27 = arith.constant 2.000000e+00 : f32
    %54 = vector.broadcast %cst_27 : f32 to vector<2x108xf32>
    %55 = arith.mulf %54, %48 : vector<2x108xf32>
    %cst_28 = arith.constant 3.600000e-03 : f32
    %56 = vector.broadcast %cst_28 : f32 to vector<2x108xf32>
    %57 = arith.addf %55, %56 : vector<2x108xf32>
    %58 = arith.mulf %53, %57 : vector<2x108xf32>
    %59 = arith.mulf %35, %35 : vector<2x108xf32>
    %60 = arith.mulf %36, %36 : vector<2x108xf32>
    %61 = arith.addf %59, %60 : vector<2x108xf32>
    %cst_29 = arith.constant 4.000000e-04 : f32
    %62 = vector.broadcast %cst_29 : f32 to vector<2x108xf32>
    %63 = arith.addf %61, %62 : vector<2x108xf32>
    %64 = arith.addf %44, %46 : vector<2x108xf32>
    %cst_30 = arith.constant 3.600000e-03 : f32
    %65 = vector.broadcast %cst_30 : f32 to vector<2x108xf32>
    %66 = arith.addf %64, %65 : vector<2x108xf32>
    %67 = arith.mulf %63, %66 : vector<2x108xf32>
    %68 = arith.divf %58, %67 : vector<2x108xf32>
    %cst_31 = arith.constant dense<0.000000e+00> : vector<2xf32>
    %69 = vector.multi_reduction <add>, %68, %cst_31 [1] : vector<2x108xf32> to vector<2xf32>
    %70 = vector.shape_cast %69 : vector<2xf32> to vector<2x1xf32>
    %cst_32 = arith.constant 0.00925925932 : f32
    %71 = vector.broadcast %cst_32 : f32 to vector<2x1xf32>
    %72 = arith.mulf %70, %71 : vector<2x1xf32>
    %73 = arith.mulf %11, %33 : vector<2x1xf32>
    %cst_33 = arith.constant 1.000000e+00 : f32
    %74 = vector.broadcast %cst_33 : f32 to vector<2x1xf32>
    %75 = arith.subf %74, %72 : vector<2x1xf32>
    %76 = arith.mulf %75, %33 : vector<2x1xf32>
    %77 = tpu.concatenate %73, %76 in 1 : vector<2x1xf32>, vector<2x1xf32> -> vector<2x2xf32>
    %c0_34 = arith.constant 0 : index
    %c0_35 = arith.constant 0 : index
    %c0_36 = arith.constant 0 : index
    %78 = vector.load %arg6[%c0_34, %c0_35, %c0_36] : memref<1x2x2xf32, #tpu.memory_space<vmem>>, vector<1x2x2xf32>
    %79 = vector.shape_cast %78 : vector<1x2x2xf32> to vector<2x2xf32>
    %80 = vector.shape_cast %77 : vector<2x2xf32> to vector<1x2x2xf32>
    tpu.vector_store %arg6[%c0_34, %c0_35, %c0_36], %80 {strides = array<i32>} : memref<1x2x2xf32, #tpu.memory_space<vmem>>, vector<1x2x2xf32>,
    return
  }
  func.func @transform_0(%arg0: i32) -> (i32, i32, i32) {
    %c0_i32 = arith.constant 0 : i32
    %c0_i32_0 = arith.constant 0 : i32
    %c0_i32_1 = arith.constant 0 : i32
    return %arg0, %c0_i32, %c0_i32_0 : i32, i32, i32
  }
  func.func @transform_1(%arg0: i32) -> (i32, i32, i32) {
    %c0_i32 = arith.constant 0 : i32
    %c0_i32_0 = arith.constant 0 : i32
    %c0_i32_1 = arith.constant 0 : i32
    return %arg0, %c0_i32, %c0_i32_0 : i32, i32, i32
  }
  func.func @transform_2(%arg0: i32) -> (i32, i32, i32) {
    %c0_i32 = arith.constant 0 : i32
    %c0_i32_0 = arith.constant 0 : i32
    %c0_i32_1 = arith.constant 0 : i32
    return %arg0, %c0_i32, %c0_i32_0 : i32, i32, i32
  }
  func.func @transform_3(%arg0: i32) -> (i32, i32) {
    %c0_i32 = arith.constant 0 : i32
    %c0_i32_0 = arith.constant 0 : i32
    %c0_i32_1 = arith.constant 0 : i32
    return %c0_i32, %c0_i32_0 : i32, i32
  }
  func.func @transform_4(%arg0: i32) -> (i32, i32) {
    %c0_i32 = arith.constant 0 : i32
    %c0_i32_0 = arith.constant 0 : i32
    %c0_i32_1 = arith.constant 0 : i32
    return %c0_i32, %c0_i32_0 : i32, i32
  }
  func.func @transform_5(%arg0: i32) -> (i32, i32, i32) {
    %c0_i32 = arith.constant 0 : i32
    %c0_i32_0 = arith.constant 0 : i32
    %c0_i32_1 = arith.constant 0 : i32
    return %arg0, %c0_i32, %c0_i32_0 : i32, i32, i32
  }
}

</mosaic_0001>

<bundles_post_ra>
// kernel: reconstruction_loss.1
= control target key start
LH: loop header
LB: loop body
LE: loop exit
PB: predicated region body
PF: predicated region fallthrough
CT: control target
= control target key end

     0   :  { %10 = vsyncpa [#allocation3], 0  ;;  %s1453_s21 = smov [#allocation2]   ;;  %s1454_s23 = smov 128   ;;  %s2912_s0 = inlined_call_operand.vmem [shape: f32[1,2,768], index: 0, kind: input, shape index: {}]   ;;  %s2913_s1 = inlined_call_operand.vmem [shape: f32[1,2,768], index: 1, kind: input, shape index: {}]   ;;  %s2914_s2 = inlined_call_operand.vmem [shape: f32[1,2,768], index: 2, kind: input, shape index: {}]   ;;  %s2915_s3 = inlined_call_operand.vmem [shape: f32[768,32], index: 3, kind: input, shape index: {}]   ;;  %s2916_s4 = inlined_call_operand.hbm [shape: f32[768,108], index: 4, kind: input, shape index: {}]   ;;  %s2917_s5 = inlined_call_operand.vmem [shape: f32[1,2,2], index: 5, kind: output, shape index: {}]  }
   0x1   :  { %s23_s20 = sshll.u32 %s2916_s4, 4  ;;  %s25_s22 = sshll.u32 %s1453_s21, 4  ;;  %s24_s20 = int_to_ptr.hbm [resolvable:$true] %s23_s20  ;;  %s26_s22 = int_to_ptr.vmem [resolvable:$true] %s25_s22 }
   0x2   :  { %s1455_s24 = smov 8  }
   0x3   :  { %31 = dma.hbm_to_vmem [thread:$0]  %s24_s20, 12288, %s26_s22, [#allocation3], %s1454_s23, %s1454_s23, %s1455_s24  }
   0x4   :  { %1451 = dma.done.wait [#allocation3], 12288  }
   0x5   :  { %1452 = vsyncadd [#allocation3], 4294955008  ;;  %v1493_v0 = vld [vmem:[%s2915_s3 + $0x78] sm:$0xff]  ;;  %v1503_v2 = vld [vmem:[%s2915_s3 + $0x70] sm:$0xff]  ;;  %vm449_vm0 = vcmask 254976   ;;  %vm63_vm1 = vcmask 1041408  }
   0x6   :  { %v1498_v1 = vld [vmem:[%s2915_s3 + $0x178] sm:$0xff]  ;;  %191 = vmatpush.msra.mxu0 %v1493_v0  ;;  %v1515_v4 = vld [vmem:[%s2915_s3 + $0x170] sm:$0xff]  ;;  %v1527_v6 = vld [vmem:[%s2915_s3 + $0x68] sm:$0xff]  ;;  %vm1322_vm6 = vcmask 877568  }
   0x7   :  { %231 = vmatpush.msra.mxu2 %v1498_v1  ;;  %v1510_v3 = vld [vmem:[%s2915_s3 + $0xf8] sm:$0xff]  ;;  %v1532_v7 = vld [vmem:[%s2915_s3 + $0xf0] sm:$0xff]  ;;  %v1537_v8 = vld [vmem:[%s2915_s3 + $0x168] sm:$0xff] }
   0x8   :  { %v1520_v5 = vld [vmem:[%s2915_s3 + $0x1f8] sm:$0xff]  ;;  %211 = vmatpush.msra.mxu1 %v1510_v3  ;;  %192 = vmatpush.msra.mxu0 %v1503_v2  ;;  %v1544_v9 = vld [vmem:[%s2915_s3 + $0x1f0] sm:$0xff]  ;;  %v1549_v10 = vld [vmem:[%s2915_s3 + $0xe8] sm:$0xff] }
   0x9   :  { %251 = vmatpush.msra.mxu3 %v1520_v5  ;;  %232 = vmatpush.msra.mxu2 %v1515_v4  ;;  %v1556_v11 = vld [vmem:[%s2915_s3 + $0x60] sm:$0xff]  ;;  %v1566_v13 = vld [vmem:[%s2915_s3 + $0x1e8] sm:$0xff]  ;;  %v1585_v16 = vld [vmem:[%s2915_s3 + $0x58] sm:$0xff] }
   0xa   :  { %212 = vmatpush.msra.mxu1 %v1532_v7  ;;  %v1561_v12 = vld [vmem:[%s2915_s3 + $0x160] sm:$0xff]  ;;  %193 = vmatpush.msra.mxu0 %v1527_v6  ;;  %v1590_v17 = vld [vmem:[%s2915_s3 + $0x158] sm:$0xff]  ;;  %v1609_v20 = vld [vmem:[%s2915_s3 + $0x50] sm:$0xff] }
   0xb   :  { %252 = vmatpush.msra.mxu3 %v1544_v9  ;;  %233 = vmatpush.msra.mxu2 %v1537_v8  ;;  %v1573_v14 = vld [vmem:[%s2915_s3 + $0xe0] sm:$0xff]  ;;  %v1597_v18 = vld [vmem:[%s2915_s3 + $0xd8] sm:$0xff]  ;;  %v1614_v21 = vld [vmem:[%s2915_s3 + $0x150] sm:$0xff] }
   0xc   :  { %v1578_v15 = vld [vmem:[%s2915_s3 + $0x1e0] sm:$0xff]  ;;  %213 = vmatpush.msra.mxu1 %v1549_v10  ;;  %194 = vmatpush.msra.mxu0 %v1556_v11  ;;  %v1602_v19 = vld [vmem:[%s2915_s3 + $0x1d8] sm:$0xff]  ;;  %v1621_v22 = vld [vmem:[%s2915_s3 + $0xd0] sm:$0xff] }
   0xd   :  { %253 = vmatpush.msra.mxu3 %v1566_v13  ;;  %234 = vmatpush.msra.mxu2 %v1561_v12  ;;  %v1626_v23 = vld [vmem:[%s2915_s3 + $0x1d0] sm:$0xff]  ;;  %v1633_v24 = vld [vmem:[%s2915_s3 + $0x48] sm:$0xff]  ;;  %v1657_v28 = vld [vmem:[%s2915_s3 + $0x40] sm:$0xff] }
   0xe   :  { %214 = vmatpush.msra.mxu1 %v1573_v14  ;;  %195 = vmatpush.msra.mxu0 %v1585_v16  ;;  %v1638_v25 = vld [vmem:[%s2915_s3 + $0x148] sm:$0xff]  ;;  %v1662_v29 = vld [vmem:[%s2915_s3 + $0x140] sm:$0xff]  ;;  %v1681_v32 = vld [vmem:[%s2915_s3 + $0x38] sm:$0xff] }
   0xf   :  { %254 = vmatpush.msra.mxu3 %v1578_v15  ;;  %235 = vmatpush.msra.mxu2 %v1590_v17  ;;  %v1645_v26 = vld [vmem:[%s2915_s3 + $0xc8] sm:$0xff]  ;;  %v1669_v30 = vld [vmem:[%s2915_s3 + $0xc0] sm:$0xff]  ;;  %v1686_v33 = vld [vmem:[%s2915_s3 + $0x138] sm:$0xff] }
  0x10   :  { %215 = vmatpush.msra.mxu1 %v1597_v18  ;;  %196 = vmatpush.msra.mxu0 %v1609_v20  ;;  %v1650_v27 = vld [vmem:[%s2915_s3 + $0x1c8] sm:$0xff]  ;;  %v1674_v31 = vld [vmem:[%s2915_s3 + $0x1c0] sm:$0xff]  ;;  %v1693_v34 = vld [vmem:[%s2915_s3 + $0xb8] sm:$0xff] }
  0x11   :  { %255 = vmatpush.msra.mxu3 %v1602_v19  ;;  %236 = vmatpush.msra.mxu2 %v1614_v21  ;;  %v1698_v35 = vld [vmem:[%s2915_s3 + $0x1b8] sm:$0xff]  ;;  %v1705_v36 = vld [vmem:[%s2915_s3 + $0x30] sm:$0xff]  ;;  %v1729_v40 = vld [vmem:[%s2915_s3 + $0x28] sm:$0xff] }
  0x12   :  { %216 = vmatpush.msra.mxu1 %v1621_v22  ;;  %197 = vmatpush.msra.mxu0 %v1633_v24  ;;  %3084 = vst [vmem:[#allocation5_spill] sm:$0xff] %v1698_v35  ;;  %v1710_v37 = vld [vmem:[%s2915_s3 + $0x130] sm:$0xff]  ;;  %v1734_v41 = vld [vmem:[%s2915_s3 + $0x128] sm:$0xff]  ;;  %v1753_v44 = vld [vmem:[%s2915_s3 + $0x20] sm:$0xff] }
  0x13   :  { %256 = vmatpush.msra.mxu3 %v1626_v23  ;;  %237 = vmatpush.msra.mxu2 %v1638_v25  ;;  %v1717_v38 = vld [vmem:[%s2915_s3 + $0xb0] sm:$0xff]  ;;  %3086 = vst [vmem:[#allocation7_spill] sm:$0xff] %v1734_v41  ;;  %v1741_v42 = vld [vmem:[%s2915_s3 + $0xa8] sm:$0xff]  ;;  %v1758_v45 = vld [vmem:[%s2915_s3 + $0x120] sm:$0xff] }
  0x14   :  { %217 = vmatpush.msra.mxu1 %v1645_v26  ;;  %198 = vmatpush.msra.mxu0 %v1657_v28  ;;  %v1722_v39 = vld [vmem:[%s2915_s3 + $0x1b0] sm:$0xff]  ;;  %v1746_v43 = vld [vmem:[%s2915_s3 + $0x1a8] sm:$0xff]  ;;  %3088 = vst [vmem:[#allocation9_spill] sm:$0xff] %v1758_v45  ;;  %v1765_v46 = vld [vmem:[%s2915_s3 + $0xa0] sm:$0xff] }
  0x15   :  { %257 = vmatpush.msra.mxu3 %v1650_v27  ;;  %238 = vmatpush.msra.mxu2 %v1662_v29  ;;  %3085 = vst [vmem:[#allocation6_spill] sm:$0xff] %v1722_v39  ;;  %v1770_v47 = vld [vmem:[%s2915_s3 + $0x1a0] sm:$0xff]  ;;  %v1777_v48 = vld [vmem:[%s2915_s3 + $0x18] sm:$0xff]  ;;  %v1801_v52 = vld [vmem:[%s2915_s3 + $0x10] sm:$0xff] }
  0x16   :  { %218 = vmatpush.msra.mxu1 %v1669_v30  ;;  %199 = vmatpush.msra.mxu0 %v1681_v32  ;;  %3087 = vst [vmem:[#allocation8_spill] sm:$0xff] %v1746_v43  ;;  %v1782_v49 = vld [vmem:[%s2915_s3 + $0x118] sm:$0xff]  ;;  %v1806_v53 = vld [vmem:[%s2915_s3 + $0x110] sm:$0xff]  ;;  %v1825_v56 = vld [vmem:[%s2915_s3 + $0x8] sm:$0xff] }
  0x17   :  { %258 = vmatpush.msra.mxu3 %v1674_v31  ;;  %239 = vmatpush.msra.mxu2 %v1686_v33  ;;  %3089 = vst [vmem:[#allocation10_spill] sm:$0xff] %v1770_v47  ;;  %v1789_v50 = vld [vmem:[%s2915_s3 + $0x98] sm:$0xff]  ;;  %v1813_v54 = vld [vmem:[%s2915_s3 + $0x90] sm:$0xff]  ;;  %v1830_v57 = vld [vmem:[%s2915_s3 + $0x108] sm:$0xff] }
  0x18   :  { %219 = vmatpush.msra.mxu1 %v1693_v34  ;;  %200 = vmatpush.msra.mxu0 %v1705_v36  ;;  %3090 = vst [vmem:[#allocation11_spill] sm:$0xff] %v1782_v49  ;;  %v1794_v51 = vld [vmem:[%s2915_s3 + $0x198] sm:$0xff]  ;;  %v1818_v55 = vld [vmem:[%s2915_s3 + $0x190] sm:$0xff]  ;;  %v1837_v58 = vld [vmem:[%s2915_s3] sm:$0xff] }
  0x19   :  { %259 = vmatpush.msra.mxu3 %v1698_v35  ;;  %240 = vmatpush.msra.mxu2 %v1710_v37  ;;  %3091 = vst [vmem:[#allocation12_spill] sm:$0xff] %v1794_v51  ;;  %v1842_v59 = vld [vmem:[%s2915_s3 + $0x88] sm:$0xff]  ;;  %v1854_v61 = vld [vmem:[%s2915_s3 + $0x100] sm:$0xff] }
  0x1a   :  { %220 = vmatpush.msra.mxu1 %v1717_v38  ;;  %201 = vmatpush.msra.mxu0 %v1729_v40  ;;  %3092 = vst [vmem:[#allocation13_spill] sm:$0xff] %v1806_v53  ;;  %v1847_v60 = vld [vmem:[%s2915_s3 + $0x188] sm:$0xff]  ;;  %v36_v62 = vld [vmem:[%s2912_s0] sm:$0xff] }
  0x1b   :  { %260 = vmatpush.msra.mxu3 %v1722_v39  ;;  %241 = vmatpush.msra.mxu2 %v1734_v41  ;;  %3093 = vst [vmem:[#allocation14_spill] sm:$0xff] %v1818_v55  ;;  %v1862_v63 = vld [vmem:[%s2913_s1] sm:$0xff]  ;;  %v1969_v41 = vld [vmem:[%s2915_s3 + $0x2d0] sm:$0xff] }
  0x1c   :  { %221 = vmatpush.msra.mxu1 %v1741_v42  ;;  %202 = vmatpush.msra.mxu0 %v1753_v44  ;;  %3094 = vst [vmem:[#allocation15_spill] sm:$0xff] %v1830_v57 }
  0x1d   :  { %261 = vmatpush.msra.mxu3 %v1746_v43  ;;  %242 = vmatpush.msra.mxu2 %v1758_v45  ;;  %3095 = vst [vmem:[#allocation16_spill] sm:$0xff] %v1847_v60  ;;  %v37_v43 = vld [vmem:[%s2912_s0 + $0x8] sm:$0xf]  ;;  %v1926_v45 = vld [vmem:[%s2915_s3 + $0x260] sm:$0xff] }
  0x1e   :  { %222 = vmatpush.msra.mxu1 %v1765_v46  ;;  %203 = vmatpush.msra.mxu0 %v1777_v48  ;;  %3096 = vst [vmem:[#allocation17_spill] sm:$0xff] %v1854_v61 }
  0x1f   :  { %262 = vmatpush.msra.mxu3 %v1770_v47  ;;  %243 = vmatpush.msra.mxu2 %v1782_v49  ;;  %3097 = vst [vmem:[#allocation18_spill] sm:$0xff] %v1862_v63  ;;  %v1889_v47 = vld [vmem:[%s2915_s3 + $0x270] sm:$0xff] }
  0x20   :  { %223 = vmatpush.msra.mxu1 %v1789_v50  ;;  %204 = vmatpush.msra.mxu0 %v1801_v52 }
  0x21   :  { %263 = vmatpush.msra.mxu3 %v1794_v51  ;;  %244 = vmatpush.msra.mxu2 %v1806_v53  ;;  %v42_v51 = vsub.f32 %v36_v62, %v1862_v63  ;;  %v1877_v53 = vld [vmem:[%s2915_s3 + $0x80] sm:$0xff] }
  0x22   :  { %224 = vmatpush.msra.mxu1 %v1813_v54  ;;  %205 = vmatpush.msra.mxu0 %v1825_v56 }
  0x23   :  { %264 = vmatpush.msra.mxu3 %v1818_v55  ;;  %245 = vmatpush.msra.mxu2 %v1830_v57  ;;  %v1869_v55 = vld [vmem:[%s2915_s3 + $0x278] sm:$0xff]  ;;  %v1882_v57 = vld [vmem:[%s2915_s3 + $0x180] sm:$0xff]  ;;  %v44_v49 = vmul.f32 %v42_v51, %v42_v51  ;;  %v1911_v51 = vld [vmem:[%s2915_s3 + $0x2f0] sm:$0xff] }
  0x24   :  { %225 = vmatpush.msra.mxu1 %v1842_v59  ;;  %3098 = vst [vmem:[#allocation19_spill] sm:$0xff] %v1882_v57  ;;  %206 = vmatpush.msra.mxu0 %v1837_v58 }
  0x25   :  { %265 = vmatpush.msra.mxu3 %v1847_v60  ;;  %246 = vmatpush.msra.mxu2 %v1854_v61  ;;  %v1894_v60 = vld [vmem:[%s2915_s3 + $0x2f8] sm:$0xff]  ;;  %v1906_v61 = vld [vmem:[%s2915_s3 + $0x268] sm:$0xff]  ;;  %48 = vst [vmem:[#allocation1] ss:$4 sm:$0xff] %v44_v49 }
  0x26   :  { %271 = vmatpush.msrb.mxu0 %v1869_v55  ;;  %226 = vmatpush.msra.mxu1 %v1877_v53  ;;  %v1931_v49 = vld [vmem:[%s2915_s3 + $0x2e8] sm:$0xff] }
  0x27   :  { %328 = vmatpush.msrb.mxu2 %v1493_v0  ;;  %266 = vmatpush.msra.mxu3 %v1882_v57  ;;  %v1916_v0 = vld [vmem:[%s2913_s1 + $0x8] sm:$0xf] }
  0x28   :  { %3099 = vst [vmem:[#allocation20_spill] sm:$0xff] %v1916_v0  ;;  %272 = vmatpush.msrb.mxu0 %v1889_v47  ;;  %291 = vmatpush.msrb.mxu1 %v1894_v60  ;;  %v43_v57 = vsub.f32 %v37_v43, %v1916_v0 }
  0x29   :  { %329 = vmatpush.msrb.mxu2 %v1503_v2  ;;  %348 = vmatpush.msrb.mxu3 %v1510_v3  ;;  %v1940_v2 = vld [vmem:[%s2915_s3 + $0x258] sm:$0xff]  ;;  %v1945_v3 = vld [vmem:[%s2915_s3 + $0x2e0] sm:$0xff] }
  0x2a   :  { %273 = vmatpush.msrb.mxu0 %v1906_v61  ;;  %292 = vmatpush.msrb.mxu1 %v1911_v51  ;;  %v45_v39 = vmul.f32 %v43_v57, %v43_v57  ;;  %v1964_v57 = vld [vmem:[%s2915_s3 + $0x248] sm:$0xff] }
  0x2b   :  { %330 = vmatpush.msrb.mxu2 %v1527_v6  ;;  %349 = vmatpush.msrb.mxu3 %v1532_v7  ;;  %v1952_v6 = vld [vmem:[%s2915_s3 + $0x250] sm:$0xff]  ;;  %v1959_v7 = vld [vmem:[%s2915_s3 + $0x2d8] sm:$0xff] }
  0x2c   :  { %274 = vmatpush.msrb.mxu0 %v1926_v45  ;;  %293 = vmatpush.msrb.mxu1 %v1931_v49  ;;  %50 = vst [vmem:[#allocation1 + $0x20] ss:$4 sm:$0xff] %v45_v39  ;;  %v1979_v39 = vld.sshfl [vmem:[#allocation1 + $0x10] sm:$0xff pattern:$0x73625140] }
  0x2d   :  { %331 = vmatpush.msrb.mxu2 %v1556_v11  ;;  %350 = vmatpush.msrb.mxu3 %v1549_v10  ;;  %v1973_v10 = vld.sshfl [vmem:[#allocation1] sm:$0xff pattern:$0x73625140]  ;;  %v1975_v11 = vld.sshfl [vmem:[#allocation1 + $0x8] sm:$0xff pattern:$0x73625140] }
  0x2e   :  { %275 = vmatpush.msrb.mxu0 %v1940_v2  ;;  %294 = vmatpush.msrb.mxu1 %v1945_v3  ;;  %3100 = vst [vmem:[#allocation21_spill] sm:$0xff] %v1973_v10  ;;  %v1981_v35 = vld.sshfl [vmem:[#allocation1 + $0x18] sm:$0xff pattern:$0x73625140]  ;;  %v2390_v10 = vld [vmem:[#allocation2 + $0x88] sm:$0xff] }
  0x2f   :  { %3101 = vst [vmem:[#allocation22_spill] sm:$0xff] %v1975_v11  ;;  %332 = vmatpush.msrb.mxu2 %v1585_v16  ;;  %351 = vmatpush.msrb.mxu3 %v1573_v14  ;;  %v1990_v11 = vld [vmem:[%s2915_s3 + $0x240] sm:$0xff]  ;;  %v1995_v14 = vld [vmem:[%s2915_s3 + $0x2c8] sm:$0xff]  ;;  %v2002_v16 = vld [vmem:[%s2915_s3 + $0x238] sm:$0xff] }
  0x30   :  { %3102 = vst [vmem:[#allocation23_spill] sm:$0xff] %v1979_v39  ;;  %276 = vmatpush.msrb.mxu0 %v1952_v6  ;;  %295 = vmatpush.msrb.mxu1 %v1959_v7  ;;  %v2050_v39 = vld [vmem:[%s2915_s3 + $0x220] sm:$0xff] }
  0x31   :  { %3103 = vst [vmem:[#allocation24_spill] sm:$0xff] %v1981_v35  ;;  %333 = vmatpush.msrb.mxu2 %v1609_v20  ;;  %352 = vmatpush.msrb.mxu3 %v1597_v18  ;;  %v2007_v18 = vld [vmem:[%s2915_s3 + $0x2c0] sm:$0xff]  ;;  %v2022_v35 = vld [vmem:[%s2915_s3 + $0x230] sm:$0xff] }
  0x32   :  { %176 = vst [vmem:[#allocation1] ss:$4 sm:$0xff] %v36_v62  ;;  %277 = vmatpush.msrb.mxu0 %v1964_v57  ;;  %296 = vmatpush.msrb.mxu1 %v1969_v41 }
  0x33   :  { %334 = vmatpush.msrb.mxu2 %v1633_v24  ;;  %353 = vmatpush.msrb.mxu3 %v1621_v22  ;;  %v2011_v20 = vld.sshfl [vmem:[#allocation1 + $0x20] sm:$0xff pattern:$0x73625140]  ;;  %v2013_v62 = vld.sshfl [vmem:[#allocation1 + $0x28] sm:$0xff pattern:$0x73625140] }
  0x34   :  { %3104 = vst [vmem:[#allocation25_spill] sm:$0xff] %v2011_v20  ;;  %278 = vmatpush.msrb.mxu0 %v1990_v11  ;;  %297 = vmatpush.msrb.mxu1 %v1995_v14  ;;  %v2027_v22 = vld [vmem:[%s2915_s3 + $0x2b8] sm:$0xff]  ;;  %v2034_v24 = vld [vmem:[%s2915_s3 + $0x228] sm:$0xff] }
  0x35   :  { %3105 = vst [vmem:[#allocation26_spill] sm:$0xff] %v2013_v62  ;;  %335 = vmatpush.msrb.mxu2 %v1657_v28  ;;  %354 = vmatpush.msrb.mxu3 %v1645_v26  ;;  %v2039_v26 = vld [vmem:[%s2915_s3 + $0x2b0] sm:$0xff] }
  0x36   :  { %178 = vst [vmem:[#allocation1 + $0x20] ss:$4 sm:$0xff] %v37_v43  ;;  %279 = vmatpush.msrb.mxu0 %v2002_v16  ;;  %298 = vmatpush.msrb.mxu1 %v2007_v18 }
  0x37   :  { %336 = vmatpush.msrb.mxu2 %v1681_v32  ;;  %355 = vmatpush.msrb.mxu3 %v1669_v30  ;;  %v2058_v30 = vld [vmem:[%s2915_s3 + $0x2a8] sm:$0xff] }
  0x38   :  { %280 = vmatpush.msrb.mxu0 %v2022_v35  ;;  %299 = vmatpush.msrb.mxu1 %v2027_v22 }
  0x39   :  { %v181_v28 = vld.sshfl [vmem:[#allocation1 + $0x10] sm:$0xff pattern:$0x73625140]  ;;  %v179_v43 = vld.sshfl [vmem:[#allocation1] sm:$0xff pattern:$0x73625140]  ;;  %337 = vmatpush.msrb.mxu2 %v1705_v36  ;;  %356 = vmatpush.msrb.mxu3 %v1693_v34 }
  0x3a   :  { %v182_v62 = vld.sshfl [vmem:[#allocation1 + $0x18] sm:$0xff pattern:$0x73625140]  ;;  %v180_v20 = vld.sshfl [vmem:[#allocation1 + $0x8] sm:$0xff pattern:$0x73625140]  ;;  %281 = vmatpush.msrb.mxu0 %v2034_v24  ;;  %300 = vmatpush.msrb.mxu1 %v2039_v26 }
  0x3b   :  { %313 = vst [vmem:[#allocation1] ss:$4 sm:$0xff] %v1862_v63  ;;  %338 = vmatpush.msrb.mxu2 %v1729_v40  ;;  %357 = vmatpush.msrb.mxu3 %v1717_v38  ;;  %v2066_v36 = vld [vmem:[%s2915_s3 + $0x218] sm:$0xff]  ;;  %v2074_v38 = vld [vmem:[%s2915_s3 + $0x2a0] sm:$0xff]  ;;  %v2081_v40 = vld [vmem:[%s2915_s3 + $0x210] sm:$0xff] }
  0x3c   :  { %247 = vmatmul.f32.vlgmr.msra.gmra.mxu2 %v181_v28  ;;  %282 = vmatpush.msrb.mxu0 %v2050_v39  ;;  %v2288_v28 = vld [vmem:[#allocation2 + $0x1d0] sm:$0xff] }
  0x3d   :  { %v183_v32 = vld.sshfl [vmem:[#allocation1 + $0x20] sm:$0xff pattern:$0x73625140]  ;;  %v184_v34 = vld.sshfl [vmem:[#allocation1 + $0x28] sm:$0xff pattern:$0x73625140]  ;;  %301 = vmatpush.msrb.mxu1 %v2058_v30  ;;  %339 = vmatpush.msrb.mxu2 %v1753_v44 }
  0x3e   :  { %315 = vst [vmem:[#allocation1 + $0x20] ss:$4 sm:$0xff] %v1916_v0  ;;  %358 = vmatpush.msrb.mxu3 %v1741_v42  ;;  %207 = vmatmul.f32.vlgmr.msra.gmra.mxu0 %v179_v43  ;;  %v2086_v44 = vld [vmem:[%s2915_s3 + $0x298] sm:$0xff]  ;;  %v2094_v42 = vld [vmem:[%s2915_s3 + $0x208] sm:$0xff] }
  0x3f   :  { %267 = vmatmul.f32.vlgmr.msra.gmra.mxu3 %v182_v62  ;;  %283 = vmatpush.msrb.mxu0 %v2066_v36  ;;  %v2099_v62 = vld [vmem:[%s2915_s3 + $0x290] sm:$0xff]  ;;  %3145 = vst [vmem:[#allocation38_spill] sm:$0xff] %v2288_v28  ;;  %v2292_v43 = vld [vmem:[#allocation2 + $0x40] sm:$0xff] }
  0x40   :  { %302 = vmatpush.msrb.mxu1 %v2074_v38  ;;  %340 = vmatpush.msrb.mxu2 %v1777_v48  ;;  %v2113_v48 = vld [vmem:[%s2915_s3 + $0x288] sm:$0xff]  ;;  %3146 = vst [vmem:[#allocation39_spill] sm:$0xff] %v2292_v43 }
  0x41   :  { %359 = vmatpush.msrb.mxu3 %v1765_v46  ;;  %227 = vmatmul.f32.vlgmr.msra.gmra.mxu1 %v180_v20  ;;  %v2108_v46 = vld [vmem:[%s2915_s3 + $0x200] sm:$0xff] }
  0x42   :  { %284 = vmatpush.msrb.mxu0 %v2081_v40  ;;  %303 = vmatpush.msrb.mxu1 %v2086_v44  ;;  %v2276_v20 = vld [vmem:[#allocation2 + $0x1d8] sm:$0xff] }
  0x43   :  { %341 = vmatpush.msrb.mxu2 %v1801_v52  ;;  %360 = vmatpush.msrb.mxu3 %v1789_v50  ;;  %v2124_v50 = vld [vmem:[%s2915_s3 + $0x280] sm:$0xff]  ;;  %3141 = vst [vmem:[#allocation34_spill] sm:$0xff] %v2276_v20 }
  0x44   :  { %285 = vmatpush.msrb.mxu0 %v2094_v42  ;;  %304 = vmatpush.msrb.mxu1 %v2099_v62  ;;  %v2137_v52 = vld [vmem:[%s2914_s2] sm:$0xff] }
  0x45   :  { %342 = vmatpush.msrb.mxu2 %v1825_v56  ;;  %361 = vmatpush.msrb.mxu3 %v1813_v54  ;;  %3106 = vst [vmem:[#allocation27_spill] sm:$0xff] %v2137_v52  ;;  %v2157_v54 = vld.sshfl [vmem:[#allocation1 + $0x10] sm:$0xff pattern:$0x73625140]  ;;  %v2224_v56 = vld [vmem:[#allocation2 + $0x170] sm:$0xff] }
  0x46   :  { %286 = vmatpush.msrb.mxu0 %v2108_v46  ;;  %305 = vmatpush.msrb.mxu1 %v2113_v48 }
  0x47   :  { %343 = vmatpush.msrb.mxu2 %v1837_v58  ;;  %362 = vmatpush.msrb.mxu3 %v1842_v59  ;;  %v2228_v58 = vld [vmem:[#allocation2 + $0x1f8] sm:$0xff]  ;;  %v2232_v59 = vld [vmem:[#allocation2 + $0x68] sm:$0xff] }
  0x48   :  { %287 = vmatmul.f32.vlgmr.msrb.gmra.mxu0 %v183_v32  ;;  %306 = vmatpush.msrb.mxu1 %v2124_v50  ;;  %v2298_v32 = vld [vmem:[#allocation2 + $0x140] sm:$0xff] }
  0x49   :  { %408 = vmatpush.msra.mxu2 %v1869_v55  ;;  %368 = vmatpush.msra.mxu0 %v1498_v1  ;;  %v2144_v1 = vld [vmem:[%s2914_s2 + $0x8] sm:$0xf]  ;;  %v2222_v55 = vld [vmem:[#allocation2 + $0xf8] sm:$0xff]  ;;  %3148 = vst [vmem:[#allocation41_spill] sm:$0xff] %v2298_v32 }
  0x4a   :  { %363 = vmatpush.msrb.mxu3 %v1877_v53  ;;  %307 = vmatmul.f32.vlgmr.msrb.gmra.mxu1 %v184_v34  ;;  %3107 = vst [vmem:[#allocation28_spill] sm:$0xff] %v2144_v1  ;;  %v2150_v53 = vld.sshfl [vmem:[#allocation1 + $0x28] sm:$0xff pattern:$0x73625140]  ;;  %v2300_v34 = vld [vmem:[#allocation2 + $0x1c8] sm:$0xff] }
  0x4b   :  { %369 = vmatpush.msra.mxu0 %v1515_v4  ;;  %388 = vmatpush.msra.mxu1 %v1520_v5  ;;  %v316_v4 = vld.sshfl [vmem:[#allocation1] sm:$0xff pattern:$0x73625140]  ;;  %3149 = vst [vmem:[#allocation42_spill] sm:$0xff] %v2300_v34 }
  0x4c   :  { %409 = vmatpush.msra.mxu2 %v1889_v47  ;;  %428 = vmatpush.msra.mxu3 %v1894_v60  ;;  %v2148_v5 = vld.sshfl [vmem:[#allocation1 + $0x20] sm:$0xff pattern:$0x73625140]  ;;  %v317_v47 = vld.sshfl [vmem:[#allocation1 + $0x8] sm:$0xff pattern:$0x73625140] }
  0x4d   :  { %370 = vmatpush.msra.mxu0 %v1537_v8  ;;  %389 = vmatpush.msra.mxu1 %v1544_v9  ;;  %605 = vst [vmem:[#allocation1 + $0x20] ss:$4 sm:$0xff] %v2144_v1  ;;  %v2159_v8 = vld.sshfl [vmem:[#allocation1 + $0x18] sm:$0xff pattern:$0x73625140]  ;;  %v3108_v9 = vld [vmem:[#allocation5_spill] sm:$0xff] }
  0x4e   :  { %410 = vmatpush.msra.mxu2 %v1906_v61  ;;  %429 = vmatpush.msra.mxu3 %v1911_v51  ;;  %603 = vst [vmem:[#allocation1] ss:$4 sm:$0xff] %v2137_v52  ;;  %v2234_v60 = vld [vmem:[#allocation2 + $0xf0] sm:$0xff]  ;;  %v2238_v61 = vld [vmem:[#allocation2 + $0x168] sm:$0xff] }
  0x4f   :  { %371 = vmatpush.msra.mxu0 %v1561_v12  ;;  %390 = vmatpush.msra.mxu1 %v1566_v13  ;;  %v3109_v12 = vld [vmem:[#allocation7_spill] sm:$0xff]  ;;  %v3110_v13 = vld [vmem:[#allocation6_spill] sm:$0xff] }
  0x50   :  { %411 = vmatpush.msra.mxu2 %v1926_v45  ;;  %430 = vmatpush.msra.mxu3 %v1931_v49  ;;  %v3123_v45 = vld [vmem:[#allocation19_spill] sm:$0xff]  ;;  %3124 = vst [vmem:[#allocation6_spill] sm:$0xff] %v2222_v55  ;;  %v2244_v49 = vld [vmem:[#allocation2 + $0x60] sm:$0xff] }
  0x51   :  { %372 = vmatpush.msra.mxu0 %v1590_v17  ;;  %391 = vmatpush.msra.mxu1 %v1578_v15  ;;  %v3111_v15 = vld [vmem:[#allocation9_spill] sm:$0xff]  ;;  %v3112_v17 = vld [vmem:[#allocation8_spill] sm:$0xff]  ;;  %v2240_v51 = vld [vmem:[#allocation2 + $0x1f0] sm:$0xff] }
  0x52   :  { %412 = vmatpush.msra.mxu2 %v1940_v2  ;;  %431 = vmatpush.msra.mxu3 %v1945_v3  ;;  %3125 = vst [vmem:[#allocation9_spill] sm:$0xff] %v2224_v56  ;;  %v2246_v2 = vld [vmem:[#allocation2 + $0xe8] sm:$0xff]  ;;  %v2250_v3 = vld [vmem:[#allocation2 + $0x160] sm:$0xff] }
  0x53   :  { %373 = vmatpush.msra.mxu0 %v1614_v21  ;;  %392 = vmatpush.msra.mxu1 %v1602_v19  ;;  %v3113_v19 = vld [vmem:[#allocation11_spill] sm:$0xff]  ;;  %v3114_v21 = vld [vmem:[#allocation10_spill] sm:$0xff]  ;;  %3126 = vst [vmem:[#allocation8_spill] sm:$0xff] %v2228_v58 }
  0x54   :  { %413 = vmatpush.msra.mxu2 %v1952_v6  ;;  %432 = vmatpush.msra.mxu3 %v1959_v7  ;;  %3127 = vst [vmem:[#allocation11_spill] sm:$0xff] %v2232_v59  ;;  %v2252_v6 = vld [vmem:[#allocation2 + $0x1e8] sm:$0xff]  ;;  %v2256_v7 = vld [vmem:[#allocation2 + $0x58] sm:$0xff] }
  0x55   :  { %374 = vmatpush.msra.mxu0 %v1638_v25  ;;  %393 = vmatpush.msra.mxu1 %v1626_v23  ;;  %v3115_v23 = vld [vmem:[#allocation13_spill] sm:$0xff]  ;;  %v3116_v25 = vld [vmem:[#allocation12_spill] sm:$0xff]  ;;  %3128 = vst [vmem:[#allocation10_spill] sm:$0xff] %v2234_v60 }
  0x56   :  { %414 = vmatpush.msra.mxu2 %v1964_v57  ;;  %433 = vmatpush.msra.mxu3 %v1969_v41  ;;  %v2218_v41 = vld [vmem:[#allocation2 + $0x70] sm:$0xff]  ;;  %3129 = vst [vmem:[#allocation13_spill] sm:$0xff] %v2238_v61  ;;  %v2258_v57 = vld [vmem:[#allocation2 + $0xe0] sm:$0xff] }
  0x57   :  { %375 = vmatpush.msra.mxu0 %v1662_v29  ;;  %394 = vmatpush.msra.mxu1 %v1650_v27  ;;  %v3117_v27 = vld [vmem:[#allocation15_spill] sm:$0xff]  ;;  %v3118_v29 = vld [vmem:[#allocation14_spill] sm:$0xff]  ;;  %3122 = vst [vmem:[#allocation7_spill] sm:$0xff] %v2218_v41 }
  0x58   :  { %415 = vmatpush.msra.mxu2 %v1990_v11  ;;  %434 = vmatpush.msra.mxu3 %v1995_v14  ;;  %3130 = vst [vmem:[#allocation12_spill] sm:$0xff] %v2240_v51  ;;  %v2262_v11 = vld [vmem:[#allocation2 + $0x158] sm:$0xff]  ;;  %v2268_v14 = vld [vmem:[#allocation2 + $0x50] sm:$0xff] }
  0x59   :  { %376 = vmatpush.msra.mxu0 %v1686_v33  ;;  %395 = vmatpush.msra.mxu1 %v1674_v31  ;;  %v2208_v31 = vld [vmem:[#allocation2 + $0x78] sm:$0xff]  ;;  %v3120_v33 = vld [vmem:[#allocation17_spill] sm:$0xff]  ;;  %3131 = vst [vmem:[#allocation15_spill] sm:$0xff] %v2244_v49 }
  0x5a   :  { %416 = vmatpush.msra.mxu2 %v2002_v16  ;;  %435 = vmatpush.msra.mxu3 %v2007_v18  ;;  %3119 = vst [vmem:[#allocation5_spill] sm:$0xff] %v2208_v31  ;;  %v2270_v16 = vld [vmem:[#allocation2 + $0xd8] sm:$0xff]  ;;  %v2274_v18 = vld [vmem:[#allocation2 + $0x150] sm:$0xff] }
  0x5b   :  { %377 = vmatpush.msra.mxu0 %v1710_v37  ;;  %396 = vmatpush.msra.mxu1 %v3108_v9  ;;  %v2212_v37 = vld [vmem:[#allocation2 + $0x178] sm:$0xff]  ;;  %3132 = vst [vmem:[#allocation14_spill] sm:$0xff] %v2246_v2  ;;  %v2348_v9 = vld [vmem:[#allocation2 + $0x1a8] sm:$0xff] }
  0x5c   :  { %417 = vmatpush.msra.mxu2 %v2022_v35  ;;  %436 = vmatpush.msra.mxu3 %v2027_v22  ;;  %v3121_v35 = vld [vmem:[#allocation16_spill] sm:$0xff]  ;;  %3133 = vst [vmem:[#allocation17_spill] sm:$0xff] %v2250_v3  ;;  %v2280_v22 = vld [vmem:[#allocation2 + $0x48] sm:$0xff] }
  0x5d   :  { %378 = vmatpush.msra.mxu0 %v3109_v12  ;;  %397 = vmatpush.msra.mxu1 %v3110_v13  ;;  %3134 = vst [vmem:[#allocation16_spill] sm:$0xff] %v2252_v6  ;;  %v2352_v12 = vld [vmem:[#allocation2 + $0x18] sm:$0xff]  ;;  %v2354_v13 = vld [vmem:[#allocation2 + $0xa0] sm:$0xff] }
  0x5e   :  { %418 = vmatpush.msra.mxu2 %v2034_v24  ;;  %437 = vmatpush.msra.mxu3 %v2039_v26  ;;  %3135 = vst [vmem:[#allocation19_spill] sm:$0xff] %v2256_v7  ;;  %v2282_v24 = vld [vmem:[#allocation2 + $0xd0] sm:$0xff]  ;;  %v2286_v26 = vld [vmem:[#allocation2 + $0x148] sm:$0xff] }
  0x5f   :  { %379 = vmatpush.msra.mxu0 %v3111_v15  ;;  %398 = vmatpush.msra.mxu1 %v3112_v17  ;;  %3136 = vst [vmem:[#allocation29_spill] sm:$0xff] %v2258_v57  ;;  %v2358_v15 = vld [vmem:[#allocation2 + $0x118] sm:$0xff]  ;;  %v2360_v17 = vld [vmem:[#allocation2 + $0x1a0] sm:$0xff] }
  0x60   :  { %419 = vmatpush.msra.mxu2 %v2050_v39  ;;  %438 = vmatpush.msra.mxu3 %v2058_v30  ;;  %3137 = vst [vmem:[#allocation30_spill] sm:$0xff] %v2262_v11  ;;  %v2264_v39 = vld [vmem:[#allocation2 + $0x1e0] sm:$0xff]  ;;  %v2294_v30 = vld [vmem:[#allocation2 + $0xc8] sm:$0xff] }
  0x61   :  { %344 = vmatmul.f32.vlgmr.msrb.gmra.mxu2 %v316_v4  ;;  %380 = vmatpush.msra.mxu0 %v3113_v19  ;;  %3138 = vst [vmem:[#allocation31_spill] sm:$0xff] %v2264_v39  ;;  %v2330_v4 = vld [vmem:[#allocation2 + $0xb0] sm:$0xff] }
  0x62   :  { %399 = vmatpush.msra.mxu1 %v3114_v21  ;;  %420 = vmatpush.msra.mxu2 %v2066_v36  ;;  %3139 = vst [vmem:[#allocation32_spill] sm:$0xff] %v2270_v16  ;;  %v2304_v36 = vld [vmem:[#allocation2 + $0x38] sm:$0xff]  ;;  %v2364_v19 = vld [vmem:[#allocation2 + $0x10] sm:$0xff] }
  0x63   :  { %439 = vmatpush.msra.mxu3 %v2074_v38  ;;  %381 = vmatpush.msra.mxu0 %v3115_v23  ;;  %3140 = vst [vmem:[#allocation33_spill] sm:$0xff] %v2274_v18  ;;  %v2306_v38 = vld [vmem:[#allocation2 + $0xc0] sm:$0xff]  ;;  %v2366_v21 = vld [vmem:[#allocation2 + $0x98] sm:$0xff]  ;;  %v2370_v23 = vld [vmem:[#allocation2 + $0x110] sm:$0xff] }
  0x64   :  { %364 = vmatmul.f32.vlgmr.msrb.gmra.mxu3 %v317_v47  ;;  %400 = vmatpush.msra.mxu1 %v3116_v25  ;;  %3142 = vst [vmem:[#allocation35_spill] sm:$0xff] %v2280_v22  ;;  %v2340_v47 = vld [vmem:[#allocation2 + $0x20] sm:$0xff]  ;;  %v2372_v25 = vld [vmem:[#allocation2 + $0x198] sm:$0xff] }
  0x65   :  { %421 = vmatpush.msra.mxu2 %v2081_v40  ;;  %440 = vmatpush.msra.mxu3 %v2086_v44  ;;  %3143 = vst [vmem:[#allocation36_spill] sm:$0xff] %v2282_v24  ;;  %v2310_v40 = vld [vmem:[#allocation2 + $0x138] sm:$0xff]  ;;  %v2312_v44 = vld [vmem:[#allocation2 + $0x1c0] sm:$0xff] }
  0x66   :  { %382 = vmatpush.msra.mxu0 %v3117_v27  ;;  %401 = vmatpush.msra.mxu1 %v3118_v29  ;;  %3144 = vst [vmem:[#allocation37_spill] sm:$0xff] %v2286_v26  ;;  %v2376_v27 = vld [vmem:[#allocation2 + $0x8] sm:$0xff]  ;;  %v2378_v29 = vld [vmem:[#allocation2 + $0x90] sm:$0xff] }
  0x67   :  { %422 = vmatpush.msra.mxu2 %v2094_v42  ;;  %441 = vmatpush.msra.mxu3 %v2099_v62  ;;  %3147 = vst [vmem:[#allocation40_spill] sm:$0xff] %v2294_v30  ;;  %v2316_v42 = vld [vmem:[#allocation2 + $0x30] sm:$0xff]  ;;  %v2318_v62 = vld [vmem:[#allocation2 + $0xb8] sm:$0xff] }
  0x68   :  { %383 = vmatpush.msra.mxu0 %v3120_v33  ;;  %402 = vmatpush.msra.mxu1 %v3121_v35  ;;  %3150 = vst [vmem:[#allocation43_spill] sm:$0xff] %v2304_v36  ;;  %v2382_v33 = vld [vmem:[#allocation2 + $0x108] sm:$0xff]  ;;  %v2384_v35 = vld [vmem:[#allocation2 + $0x190] sm:$0xff] }
  0x69   :  { %423 = vmatpush.msra.mxu2 %v2108_v46  ;;  %442 = vmatpush.msra.mxu3 %v2113_v48  ;;  %3151 = vst [vmem:[#allocation44_spill] sm:$0xff] %v2306_v38  ;;  %v2322_v46 = vld [vmem:[#allocation2 + $0x130] sm:$0xff]  ;;  %v2324_v48 = vld [vmem:[#allocation2 + $0x1b8] sm:$0xff] }
  0x6a   :  { %424 = vmatmul.f32.vlgmr.msra.gmra.mxu2 %v2148_v5  ;;  %618 = vmatpush.msrb.mxu0 %v2208_v31  ;;  %3152 = vst [vmem:[#allocation45_spill] sm:$0xff] %v2310_v40  ;;  %v2334_v5 = vld [vmem:[#allocation2 + $0x128] sm:$0xff] }
  0x6b   :  { %658 = vmatpush.msrb.mxu2 %v2212_v37  ;;  %403 = vmatpush.msra.mxu1 %v3123_v45  ;;  %3153 = vst [vmem:[#allocation46_spill] sm:$0xff] %v2312_v44  ;;  %v2388_v45 = vld [vmem:[#allocation2] sm:$0xff] }
  0x6c   :  { %443 = vmatpush.msra.mxu3 %v2124_v50  ;;  %384 = vmatmul.f32.vlgmr.msra.gmra.mxu0 %v2157_v54  ;;  %3154 = vst [vmem:[#allocation47_spill] sm:$0xff] %v2316_v42  ;;  %v2328_v50 = vld [vmem:[#allocation2 + $0x28] sm:$0xff] }
  0x6d   :  { %444 = vmatmul.f32.vlgmr.msra.gmra.mxu3 %v2150_v53  ;;  %619 = vmatpush.msrb.mxu0 %v2218_v41  ;;  %3155 = vst [vmem:[#allocation48_spill] sm:$0xff] %v2318_v62  ;;  %v2336_v53 = vld [vmem:[#allocation2 + $0x1b0] sm:$0xff]  ;;  %v2342_v54 = vld [vmem:[#allocation2 + $0xa8] sm:$0xff] }
  0x6e   :  { %638 = vmatpush.msrb.mxu1 %v2222_v55  ;;  %659 = vmatpush.msrb.mxu2 %v2224_v56  ;;  %3156 = vst [vmem:[#allocation49_spill] sm:$0xff] %v2322_v46 }
  0x6f   :  { %678 = vmatpush.msrb.mxu3 %v2228_v58  ;;  %404 = vmatmul.f32.vlgmr.msra.gmra.mxu1 %v2159_v8  ;;  %3157 = vst [vmem:[#allocation50_spill] sm:$0xff] %v2324_v48  ;;  %v2346_v8 = vld [vmem:[#allocation2 + $0x120] sm:$0xff] }
  0x70   :  { %620 = vmatpush.msrb.mxu0 %v2232_v59  ;;  %639 = vmatpush.msrb.mxu1 %v2234_v60  ;;  %3158 = vst [vmem:[#allocation51_spill] sm:$0xff] %v2330_v4 }
  0x71   :  { %660 = vmatpush.msrb.mxu2 %v2238_v61  ;;  %679 = vmatpush.msrb.mxu3 %v2240_v51  ;;  %3159 = vst [vmem:[#allocation52_spill] sm:$0xff] %v2334_v5 }
  0x72   :  { %621 = vmatpush.msrb.mxu0 %v2244_v49  ;;  %640 = vmatpush.msrb.mxu1 %v2246_v2  ;;  %3160 = vst [vmem:[#allocation53_spill] sm:$0xff] %v2336_v53 }
  0x73   :  { %661 = vmatpush.msrb.mxu2 %v2250_v3  ;;  %680 = vmatpush.msrb.mxu3 %v2252_v6  ;;  %3161 = vst [vmem:[#allocation54_spill] sm:$0xff] %v2340_v47 }
  0x74   :  { %622 = vmatpush.msrb.mxu0 %v2256_v7  ;;  %641 = vmatpush.msrb.mxu1 %v2258_v57  ;;  %3162 = vst [vmem:[#allocation55_spill] sm:$0xff] %v2342_v54 }
  0x75   :  { %662 = vmatpush.msrb.mxu2 %v2262_v11  ;;  %681 = vmatpush.msrb.mxu3 %v2264_v39  ;;  %3163 = vst [vmem:[#allocation56_spill] sm:$0xff] %v2346_v8 }
  0x76   :  { %623 = vmatpush.msrb.mxu0 %v2268_v14  ;;  %642 = vmatpush.msrb.mxu1 %v2270_v16  ;;  %3164 = vst [vmem:[#allocation57_spill] sm:$0xff] %v2348_v9 }
  0x77   :  { %663 = vmatpush.msrb.mxu2 %v2274_v18  ;;  %682 = vmatpush.msrb.mxu3 %v2276_v20  ;;  %3165 = vst [vmem:[#allocation58_spill] sm:$0xff] %v2354_v13 }
  0x78   :  { %624 = vmatpush.msrb.mxu0 %v2280_v22  ;;  %643 = vmatpush.msrb.mxu1 %v2282_v24  ;;  %3166 = vst [vmem:[#allocation59_spill] sm:$0xff] %v2358_v15 }
  0x79   :  { %664 = vmatpush.msrb.mxu2 %v2286_v26  ;;  %683 = vmatpush.msrb.mxu3 %v2288_v28  ;;  %3167 = vst [vmem:[#allocation60_spill] sm:$0xff] %v2360_v17 }
  0x7a   :  { %625 = vmatpush.msrb.mxu0 %v2292_v43  ;;  %644 = vmatpush.msrb.mxu1 %v2294_v30  ;;  %3168 = vst [vmem:[#allocation61_spill] sm:$0xff] %v2370_v23 }
  0x7b   :  { %665 = vmatpush.msrb.mxu2 %v2298_v32  ;;  %684 = vmatpush.msrb.mxu3 %v2300_v34  ;;  %3169 = vst [vmem:[#allocation62_spill] sm:$0xff] %v2372_v25 }
  0x7c   :  { %626 = vmatpush.msrb.mxu0 %v2304_v36  ;;  %645 = vmatpush.msrb.mxu1 %v2306_v38  ;;  %3170 = vst [vmem:[#allocation63_spill] sm:$0xff] %v2382_v33 }
  0x7d   :  { %666 = vmatpush.msrb.mxu2 %v2310_v40  ;;  %685 = vmatpush.msrb.mxu3 %v2312_v44  ;;  %3171 = vst [vmem:[#allocation64_spill] sm:$0xff] %v2384_v35  ;;  %v2445_v44 = vld [vmem:[#allocation2 + $0x2e0] sm:$0xff] }
  0x7e   :  { %627 = vmatpush.msrb.mxu0 %v2316_v42  ;;  %646 = vmatpush.msrb.mxu1 %v2318_v62  ;;  %3178 = vst [vmem:[#allocation71_spill] sm:$0xff] %v2445_v44  ;;  %v2482_v40 = vld [vmem:[#allocation2 + $0x2c0] sm:$0xff] }
  0x7f   :  { %667 = vmatpush.msrb.mxu2 %v2322_v46  ;;  %686 = vmatpush.msrb.mxu3 %v2324_v48  ;;  %v2422_v48 = vld.sshfl [vmem:[#allocation1] sm:$0xff pattern:$0x73625140]  ;;  %v2437_v46 = vld [vmem:[#allocation2 + $0x2e8] sm:$0xff]  ;;  %3186 = vst [vmem:[#allocation79_spill] sm:$0xff] %v2482_v40 }
  0x80   :  { %628 = vmatpush.msrb.mxu0 %v2328_v50  ;;  %647 = vmatpush.msrb.mxu1 %v2330_v4 }
  0x81   :  { %668 = vmatpush.msrb.mxu2 %v2334_v5  ;;  %687 = vmatpush.msrb.mxu3 %v2336_v53  ;;  %v2412_v53 = vld [vmem:[#allocation2 + $0x2f8] sm:$0xff]  ;;  %v2420_v5 = vld.sshfl [vmem:[#allocation1 + $0x10] sm:$0xff pattern:$0x73625140] }
  0x82   :  { %629 = vmatpush.msrb.mxu0 %v2340_v47  ;;  %648 = vmatpush.msrb.mxu1 %v2342_v54  ;;  %3177 = vst [vmem:[#allocation70_spill] sm:$0xff] %v2412_v53 }
  0x83   :  { %669 = vmatpush.msrb.mxu2 %v2346_v8  ;;  %688 = vmatpush.msrb.mxu3 %v2348_v9  ;;  %v2400_v9 = vld [vmem:[#allocation2 + $0x278] sm:$0xff]  ;;  %v2408_v8 = vld [vmem:[#allocation2 + $0x270] sm:$0xff] }
  0x84   :  { %630 = vmatpush.msrb.mxu0 %v2352_v12  ;;  %649 = vmatpush.msrb.mxu1 %v2354_v13  ;;  %3176 = vst [vmem:[#allocation69_spill] sm:$0xff] %v2408_v8 }
  0x85   :  { %670 = vmatpush.msrb.mxu2 %v2358_v15  ;;  %689 = vmatpush.msrb.mxu3 %v2360_v17  ;;  %v2394_v17 = vld [vmem:[#allocation2 + $0x100] sm:$0xff]  ;;  %v2396_v15 = vld [vmem:[#allocation2 + $0x188] sm:$0xff] }
  0x86   :  { %631 = vmatpush.msrb.mxu0 %v2364_v19  ;;  %650 = vmatpush.msrb.mxu1 %v2366_v21  ;;  %3172 = vst [vmem:[#allocation65_spill] sm:$0xff] %v2394_v17 }
  0x87   :  { %671 = vmatpush.msrb.mxu2 %v2370_v23  ;;  %690 = vmatpush.msrb.mxu3 %v2372_v25  ;;  %3173 = vst [vmem:[#allocation66_spill] sm:$0xff] %v2396_v15  ;;  %v2404_v25 = vld [vmem:[#allocation2 + $0x80] sm:$0xff] }
  0x88   :  { %632 = vmatpush.msrb.mxu0 %v2376_v27  ;;  %651 = vmatpush.msrb.mxu1 %v2378_v29  ;;  %3174 = vst [vmem:[#allocation67_spill] sm:$0xff] %v2404_v25  ;;  %v2406_v23 = vld [vmem:[#allocation2 + $0x180] sm:$0xff] }
  0x89   :  { %672 = vmatpush.msrb.mxu2 %v2382_v33  ;;  %691 = vmatpush.msrb.mxu3 %v2384_v35  ;;  %3175 = vst [vmem:[#allocation68_spill] sm:$0xff] %v2406_v23  ;;  %v2414_v33 = vld [vmem:[#allocation2 + $0x268] sm:$0xff]  ;;  %v2416_v35 = vld [vmem:[#allocation2 + $0x2f0] sm:$0xff] }
  0x8a   :  { %633 = vmatpush.msrb.mxu0 %v2388_v45  ;;  %652 = vmatpush.msrb.mxu1 %v2390_v10 }
  0x8b   :  { %673 = vmatpush.msrb.mxu2 %v2394_v17  ;;  %692 = vmatpush.msrb.mxu3 %v2396_v15  ;;  %v2426_v17 = vld.sshfl [vmem:[#allocation1 + $0x18] sm:$0xff pattern:$0x73625140]  ;;  %v2428_v15 = vld.sshfl [vmem:[#allocation1 + $0x8] sm:$0xff pattern:$0x73625140] }
  0x8c   :  { %698 = vmatpush.msra.mxu0 %v2400_v9  ;;  %653 = vmatpush.msrb.mxu1 %v2404_v25  ;;  %738 = vst [vmem:[#allocation1] ss:$4 sm:$0xff] %v1862_v63  ;;  %v2451_v63 = vld [vmem:[#allocation2 + $0x250] sm:$0xff] }
  0x8d   :  { %753 = vmatpush.msra.mxu2 %v2208_v31  ;;  %693 = vmatpush.msrb.mxu3 %v2406_v23  ;;  %v2435_v31 = vld [vmem:[#allocation2 + $0x260] sm:$0xff]  ;;  %v2443_v23 = vld [vmem:[#allocation2 + $0x258] sm:$0xff]  ;;  %3179 = vst [vmem:[#allocation72_spill] sm:$0xff] %v2451_v63 }
  0x8e   :  { %699 = vmatpush.msra.mxu0 %v2408_v8  ;;  %718 = vmatpush.msra.mxu1 %v2412_v53 }
  0x8f   :  { %754 = vmatpush.msra.mxu2 %v2218_v41  ;;  %773 = vmatpush.msra.mxu3 %v2222_v55  ;;  %v2453_v55 = vld [vmem:[#allocation2 + $0x2d8] sm:$0xff]  ;;  %v2471_v41 = vld [vmem:[#allocation2 + $0x240] sm:$0xff] }
  0x90   :  { %700 = vmatpush.msra.mxu0 %v2414_v33  ;;  %719 = vmatpush.msra.mxu1 %v2416_v35  ;;  %3180 = vst [vmem:[#allocation73_spill] sm:$0xff] %v2453_v55 }
  0x91   :  { %755 = vmatpush.msra.mxu2 %v2232_v59  ;;  %774 = vmatpush.msra.mxu3 %v2234_v60  ;;  %v2459_v60 = vld [vmem:[#allocation2 + $0x248] sm:$0xff]  ;;  %v2461_v59 = vld [vmem:[#allocation2 + $0x2d0] sm:$0xff]  ;;  %3183 = vst [vmem:[#allocation76_spill] sm:$0xff] %v2471_v41 }
  0x92   :  { %701 = vmatpush.msra.mxu0 %v2435_v31  ;;  %720 = vmatpush.msra.mxu1 %v2437_v46  ;;  %3181 = vst [vmem:[#allocation74_spill] sm:$0xff] %v2459_v60 }
  0x93   :  { %756 = vmatpush.msra.mxu2 %v2244_v49  ;;  %775 = vmatpush.msra.mxu3 %v2246_v2  ;;  %3182 = vst [vmem:[#allocation75_spill] sm:$0xff] %v2461_v59  ;;  %v2465_v2 = vld.sshfl [vmem:[#allocation1 + $0x20] sm:$0xff pattern:$0x73625140] }
  0x94   :  { %702 = vmatpush.msra.mxu0 %v2443_v23  ;;  %721 = vmatpush.msra.mxu1 %v2445_v44  ;;  %v2467_v49 = vld.sshfl [vmem:[#allocation1 + $0x28] sm:$0xff pattern:$0x73625140] }
  0x95   :  { %757 = vmatpush.msra.mxu2 %v2256_v7  ;;  %776 = vmatpush.msra.mxu3 %v2258_v57  ;;  %v2473_v7 = vld [vmem:[#allocation2 + $0x2c8] sm:$0xff]  ;;  %740 = vst [vmem:[#allocation1 + $0x20] ss:$4 sm:$0xff] %v1916_v0  ;;  %v2480_v57 = vld [vmem:[#allocation2 + $0x238] sm:$0xff]  ;;  %v2488_v0 = vld [vmem:[#allocation2 + $0x230] sm:$0xff] }
  0x96   :  { %703 = vmatpush.msra.mxu0 %v2451_v63  ;;  %722 = vmatpush.msra.mxu1 %v2453_v55  ;;  %3184 = vst [vmem:[#allocation77_spill] sm:$0xff] %v2473_v7 }
  0x97   :  { %758 = vmatpush.msra.mxu2 %v2268_v14  ;;  %777 = vmatpush.msra.mxu3 %v2270_v16  ;;  %3185 = vst [vmem:[#allocation78_spill] sm:$0xff] %v2480_v57  ;;  %v2490_v16 = vld [vmem:[#allocation2 + $0x2b8] sm:$0xff] }
  0x98   :  { %704 = vmatpush.msra.mxu0 %v2459_v60  ;;  %723 = vmatpush.msra.mxu1 %v2461_v59  ;;  %3187 = vst [vmem:[#allocation80_spill] sm:$0xff] %v2488_v0 }
  0x99   :  { %759 = vmatpush.msra.mxu2 %v2280_v22  ;;  %778 = vmatpush.msra.mxu3 %v2282_v24  ;;  %3188 = vst [vmem:[#allocation81_spill] sm:$0xff] %v2490_v16  ;;  %v2496_v24 = vld [vmem:[#allocation2 + $0x228] sm:$0xff]  ;;  %v2498_v22 = vld [vmem:[#allocation2 + $0x2b0] sm:$0xff] }
  0x9a   :  { %705 = vmatpush.msra.mxu0 %v2471_v41  ;;  %724 = vmatpush.msra.mxu1 %v2473_v7  ;;  %3189 = vst [vmem:[#allocation82_spill] sm:$0xff] %v2496_v24 }
  0x9b   :  { %760 = vmatpush.msra.mxu2 %v2292_v43  ;;  %779 = vmatpush.msra.mxu3 %v2294_v30  ;;  %3190 = vst [vmem:[#allocation83_spill] sm:$0xff] %v2498_v22  ;;  %v2504_v30 = vld [vmem:[#allocation2 + $0x220] sm:$0xff]  ;;  %v2506_v43 = vld [vmem:[#allocation2 + $0x2a8] sm:$0xff] }
  0x9c   :  { %706 = vmatpush.msra.mxu0 %v2480_v57  ;;  %725 = vmatpush.msra.mxu1 %v2482_v40 }
  0x9d   :  { %761 = vmatpush.msra.mxu2 %v2304_v36  ;;  %780 = vmatpush.msra.mxu3 %v2306_v38  ;;  %v2512_v38 = vld [vmem:[#allocation2 + $0x218] sm:$0xff]  ;;  %v2514_v36 = vld [vmem:[#allocation2 + $0x2a0] sm:$0xff] }
  0x9e   :  { %707 = vmatpush.msra.mxu0 %v2488_v0  ;;  %726 = vmatpush.msra.mxu1 %v2490_v16  ;;  %3191 = vst [vmem:[#allocation84_spill] sm:$0xff] %v2512_v38 }
  0x9f   :  { %762 = vmatpush.msra.mxu2 %v2316_v42  ;;  %781 = vmatpush.msra.mxu3 %v2318_v62  ;;  %3192 = vst [vmem:[#allocation85_spill] sm:$0xff] %v2514_v36  ;;  %v2520_v62 = vld [vmem:[#allocation2 + $0x210] sm:$0xff]  ;;  %v2522_v42 = vld [vmem:[#allocation2 + $0x298] sm:$0xff] }
  0xa0   :  { %708 = vmatpush.msra.mxu0 %v2496_v24  ;;  %727 = vmatpush.msra.mxu1 %v2498_v22  ;;  %3193 = vst [vmem:[#allocation86_spill] sm:$0xff] %v2522_v42 }
  0xa1   :  { %763 = vmatpush.msra.mxu2 %v2328_v50  ;;  %782 = vmatpush.msra.mxu3 %v2330_v4  ;;  %v2528_v4 = vld [vmem:[#allocation2 + $0x208] sm:$0xff] }
  0xa2   :  { %709 = vmatpush.msra.mxu0 %v2504_v30  ;;  %728 = vmatpush.msra.mxu1 %v2506_v43  ;;  %3194 = vst [vmem:[#allocation87_spill] sm:$0xff] %v2528_v4 }
  0xa3   :  { %764 = vmatpush.msra.mxu2 %v2340_v47  ;;  %783 = vmatpush.msra.mxu3 %v2342_v54  ;;  %v2532_v47 = vld [vmem:[#allocation2 + $0x290] sm:$0xff]  ;;  %v2538_v54 = vld [vmem:[#allocation2 + $0x200] sm:$0xff] }
  0xa4   :  { %710 = vmatpush.msra.mxu0 %v2512_v38  ;;  %729 = vmatpush.msra.mxu1 %v2514_v36 }
  0xa5   :  { %765 = vmatpush.msra.mxu2 %v2352_v12  ;;  %784 = vmatpush.msra.mxu3 %v2354_v13  ;;  %v2542_v13 = vld [vmem:[#allocation2 + $0x288] sm:$0xff] }
  0xa6   :  { %711 = vmatpush.msra.mxu0 %v2520_v62  ;;  %730 = vmatpush.msra.mxu1 %v2522_v42 }
  0xa7   :  { %766 = vmatpush.msra.mxu2 %v2364_v19  ;;  %785 = vmatpush.msra.mxu3 %v2366_v21 }
  0xa8   :  { %674 = vmatmul.f32.vlgmr.msrb.gmra.mxu2 %v2420_v5  ;;  %712 = vmatpush.msra.mxu0 %v2528_v4  ;;  %v2550_v5 = vld [vmem:[#allocation2 + $0x280] sm:$0xff] }
  0xa9   :  { %731 = vmatpush.msra.mxu1 %v2532_v47  ;;  %767 = vmatpush.msra.mxu2 %v2376_v27  ;;  %3195 = vst [vmem:[#allocation88_spill] sm:$0xff] %v2550_v5 }
  0xaa   :  { %786 = vmatpush.msra.mxu3 %v2378_v29  ;;  %634 = vmatmul.f32.vlgmr.msrb.gmra.mxu0 %v2422_v48  ;;  %v874_v48 = vmul.f32 %v2144_v1, %v2144_v1  ;;  %v2570_v1 = vld.sshfl [vmem:[#allocation1 + $0x28] sm:$0xff pattern:$0x73625140] }
  0xab   :  { %694 = vmatmul.f32.vlgmr.msrb.gmra.mxu3 %v2426_v17  ;;  %713 = vmatpush.msra.mxu0 %v2538_v54  ;;  %v2568_v17 = vld.sshfl [vmem:[#allocation1 + $0x20] sm:$0xff pattern:$0x73625140] }
  0xac   :  { %732 = vmatpush.msra.mxu1 %v2542_v13  ;;  %768 = vmatpush.msra.mxu2 %v2388_v45  ;;  %879 = vst [vmem:[#allocation1 + $0x20] ss:$4 sm:$0xff] %v874_v48  ;;  %v3197_v48 = vld [vmem:[#allocation46_spill] sm:$0xff] }
  0xad   :  { %787 = vmatpush.msra.mxu3 %v2390_v10  ;;  %654 = vmatmul.f32.vlgmr.msrb.gmra.mxu1 %v2428_v15  ;;  %v873_v15 = vmul.f32 %v2137_v52, %v2137_v52  ;;  %v2578_v52 = vld.sshfl [vmem:[#allocation1 + $0x10] sm:$0xff pattern:$0x73625140] }
  0xae   :  { %793 = vmatpush.msrb.mxu0 %v2212_v37  ;;  %833 = vmatpush.msrb.mxu2 %v2400_v9 }
  0xaf   :  { %733 = vmatpush.msra.mxu1 %v2550_v5  ;;  %788 = vmatpush.msra.mxu3 %v2404_v25  ;;  %v2580_v25 = vld.sshfl [vmem:[#allocation1 + $0x18] sm:$0xff pattern:$0x73625140] }
  0xb0   :  { %794 = vmatpush.msrb.mxu0 %v2224_v56  ;;  %834 = vmatpush.msrb.mxu2 %v2408_v8  ;;  %v742_v8 = vld.sshfl [vmem:[#allocation1 + $0x8] sm:$0xff pattern:$0x73625140] }
  0xb1   :  { %813 = vmatpush.msrb.mxu1 %v2228_v58  ;;  %853 = vmatpush.msrb.mxu3 %v2412_v53  ;;  %v741_v53 = vld.sshfl [vmem:[#allocation1] sm:$0xff pattern:$0x73625140] }
  0xb2   :  { %795 = vmatpush.msrb.mxu0 %v2238_v61  ;;  %835 = vmatpush.msrb.mxu2 %v2414_v33  ;;  %877 = vst [vmem:[#allocation1] ss:$4 sm:$0xff] %v873_v15 }
  0xb3   :  { %814 = vmatpush.msrb.mxu1 %v2240_v51  ;;  %854 = vmatpush.msrb.mxu3 %v2416_v35 }
  0xb4   :  { %714 = vmatmul.f32.vlgmr.msra.gmra.mxu0 %v2465_v2  ;;  %836 = vmatpush.msrb.mxu2 %v2435_v31  ;;  %v3196_v2 = vld [vmem:[#allocation45_spill] sm:$0xff] }
  0xb5   :  { %815 = vmatpush.msrb.mxu1 %v2252_v6  ;;  %796 = vmatpush.msrb.mxu0 %v2250_v3 }
  0xb6   :  { %855 = vmatpush.msrb.mxu3 %v2437_v46  ;;  %734 = vmatmul.f32.vlgmr.msra.gmra.mxu1 %v2467_v49 }
  0xb7   :  { %797 = vmatpush.msrb.mxu0 %v2262_v11  ;;  %816 = vmatpush.msrb.mxu1 %v2264_v39 }
  0xb8   :  { %837 = vmatpush.msrb.mxu2 %v2443_v23  ;;  %856 = vmatpush.msrb.mxu3 %v2445_v44 }
  0xb9   :  { %798 = vmatpush.msrb.mxu0 %v2274_v18  ;;  %817 = vmatpush.msrb.mxu1 %v2276_v20 }
  0xba   :  { %838 = vmatpush.msrb.mxu2 %v2451_v63  ;;  %857 = vmatpush.msrb.mxu3 %v2453_v55  ;;  %v3201_v63 = vld [vmem:[#allocation53_spill] sm:$0xff] }
  0xbb   :  { %799 = vmatpush.msrb.mxu0 %v2286_v26  ;;  %818 = vmatpush.msrb.mxu1 %v2288_v28  ;;  %v208_v15 = vpop.f32.mrf.mxu0 }
  0xbc   :  { %839 = vmatpush.msrb.mxu2 %v2459_v60  ;;  %858 = vmatpush.msrb.mxu3 %v2461_v59  ;;  %v3198_v60 = vld [vmem:[#allocation49_spill] sm:$0xff]  ;;  %v3199_v59 = vld [vmem:[#allocation50_spill] sm:$0xff] }
  0xbd   :  { %800 = vmatpush.msrb.mxu0 %v2298_v32  ;;  %819 = vmatpush.msrb.mxu1 %v2300_v34 }
  0xbe   :  { %840 = vmatpush.msrb.mxu2 %v2471_v41  ;;  %859 = vmatpush.msrb.mxu3 %v2473_v7  ;;  %v228_v49 = vpop.f32.mrf.mxu1  ;;  %v3200_v41 = vld [vmem:[#allocation52_spill] sm:$0xff] }
  0xbf   :  { %801 = vmatpush.msrb.mxu0 %v3196_v2  ;;  %820 = vmatpush.msrb.mxu1 %v3197_v48  ;;  %v229_v55 = vadd.f32 %v228_v49, %v208_v15  ;;  %v248_v7 = vpop.f32.mrf.mxu2  ;;  %v3204_v15 = vld [vmem:[#allocation59_spill] sm:$0xff] }
  0xc0   :  { %841 = vmatpush.msrb.mxu2 %v2480_v57  ;;  %860 = vmatpush.msrb.mxu3 %v2482_v40  ;;  %v3202_v40 = vld [vmem:[#allocation56_spill] sm:$0xff]  ;;  %v3203_v57 = vld [vmem:[#allocation57_spill] sm:$0xff] }
  0xc1   :  { %802 = vmatpush.msrb.mxu0 %v3198_v60  ;;  %821 = vmatpush.msrb.mxu1 %v3199_v59  ;;  %v249_v44 = vadd.f32 %v248_v7, %v229_v55  ;;  %v3208_v7 = vld [vmem:[#allocation63_spill] sm:$0xff] }
  0xc2   :  { %842 = vmatpush.msrb.mxu2 %v2488_v0  ;;  %861 = vmatpush.msrb.mxu3 %v2490_v16  ;;  %v268_v49 = vpop.f32.mrf.mxu3  ;;  %v3205_v16 = vld [vmem:[#allocation60_spill] sm:$0xff]  ;;  %v3207_v0 = vld [vmem:[#allocation62_spill] sm:$0xff] }
  0xc3   :  { %803 = vmatpush.msrb.mxu0 %v3200_v41  ;;  %822 = vmatpush.msrb.mxu1 %v3201_v63 }
  0xc4   :  { %843 = vmatpush.msrb.mxu2 %v2496_v24  ;;  %862 = vmatpush.msrb.mxu3 %v2498_v22  ;;  %v3206_v22 = vld [vmem:[#allocation61_spill] sm:$0xff]  ;;  %v269_v24 = vadd.f32 %v268_v49, %v249_v44  ;;  %v3211_v44 = vld [vmem:[#allocation66_spill] sm:$0xff] }
  0xc5   :  { %804 = vmatpush.msrb.mxu0 %v3202_v40  ;;  %823 = vmatpush.msrb.mxu1 %v3203_v57  ;;  %v288_v55 = vpop.f32.mrf.mxu0  ;;  %v3212_v49 = vld [vmem:[#allocation5_spill] sm:$0xff] }
  0xc6   :  { %844 = vmatpush.msrb.mxu2 %v2504_v30  ;;  %863 = vmatpush.msrb.mxu3 %v2506_v43 }
  0xc7   :  { %769 = vmatmul.f32.vlgmr.msra.gmra.mxu2 %v741_v53  ;;  %805 = vmatpush.msrb.mxu0 %v3204_v15  ;;  %v3209_v53 = vld [vmem:[#allocation64_spill] sm:$0xff] }
  0xc8   :  { %824 = vmatpush.msrb.mxu1 %v3205_v16  ;;  %845 = vmatpush.msrb.mxu2 %v2512_v38  ;;  %v3210_v38 = vld [vmem:[#allocation65_spill] sm:$0xff] }
  0xc9   :  { %864 = vmatpush.msrb.mxu3 %v2514_v36  ;;  %806 = vmatpush.msrb.mxu0 %v3206_v22  ;;  %v289_v36 = vadd.f32 %v288_v55, %v269_v24  ;;  %v3214_v24 = vld [vmem:[#allocation7_spill] sm:$0xff]  ;;  %v3215_v55 = vld [vmem:[#allocation6_spill] sm:$0xff] }
  0xca   :  { %789 = vmatmul.f32.vlgmr.msra.gmra.mxu3 %v742_v8  ;;  %825 = vmatpush.msrb.mxu1 %v3207_v0  ;;  %v308_v8 = vpop.f32.mrf.mxu1 }
  0xcb   :  { %846 = vmatpush.msrb.mxu2 %v2520_v62  ;;  %865 = vmatpush.msrb.mxu3 %v2522_v42  ;;  %v3213_v42 = vld [vmem:[#allocation68_spill] sm:$0xff] }
  0xcc   :  { %807 = vmatpush.msrb.mxu0 %v3208_v7  ;;  %826 = vmatpush.msrb.mxu1 %v3209_v53 }
  0xcd   :  { %847 = vmatpush.msrb.mxu2 %v2528_v4  ;;  %866 = vmatpush.msrb.mxu3 %v2532_v47  ;;  %v2636_v4 = vadd.f32 %v308_v8, %v289_v36  ;;  %v3217_v8 = vld [vmem:[#allocation10_spill] sm:$0xff] }
  0xce   :  { %808 = vmatpush.msrb.mxu0 %v3210_v38  ;;  %827 = vmatpush.msrb.mxu1 %v3211_v44 }
  0xcf   :  { %848 = vmatpush.msrb.mxu2 %v2538_v54  ;;  %867 = vmatpush.msrb.mxu3 %v2542_v13  ;;  %v453_v36 = vmul.f32 %v2636_v4, %v2636_v4 }
  0xd0   :  { %849 = vmatmul.f32.vlgmr.msrb.gmra.mxu2 %v2568_v17  ;;  %892 = vmatpush.msra.mxu0 %v3212_v49  ;;  %v3216_v17 = vld [vmem:[#allocation11_spill] sm:$0xff] }
  0xd1   :  { %932 = vmatpush.msra.mxu2 %v2212_v37  ;;  %828 = vmatpush.msrb.mxu1 %v3213_v42 }
  0xd2   :  { %868 = vmatpush.msrb.mxu3 %v2550_v5  ;;  %809 = vmatmul.f32.vlgmr.msrb.gmra.mxu0 %v2578_v52  ;;  %v3218_v52 = vld [vmem:[#allocation15_spill] sm:$0xff]  ;;  %v3235_v5 = vld [vmem:[#allocation58_spill] sm:$0xff] }
  0xd3   :  { %869 = vmatmul.f32.vlgmr.msrb.gmra.mxu3 %v2570_v1  ;;  %893 = vmatpush.msra.mxu0 %v3214_v24  ;;  %v3219_v1 = vld [vmem:[#allocation14_spill] sm:$0xff] }
  0xd4   :  { %912 = vmatpush.msra.mxu1 %v3215_v55  ;;  %933 = vmatpush.msra.mxu2 %v2224_v56  ;;  %v3221_v56 = vld [vmem:[#allocation29_spill] sm:$0xff] }
  0xd5   :  { %952 = vmatpush.msra.mxu3 %v2228_v58  ;;  %829 = vmatmul.f32.vlgmr.msrb.gmra.mxu1 %v2580_v25  ;;  %v454_v25 = vsel %vm449_vm0, %v453_v36, 0.0  ;;  %v3220_v58 = vld [vmem:[#allocation19_spill] sm:$0xff]  ;;  %v3224_v36 = vld [vmem:[#allocation36_spill] sm:$0xff] }
  0xd6   :  { %894 = vmatpush.msra.mxu0 %v3216_v17  ;;  %913 = vmatpush.msra.mxu1 %v3217_v8 }
  0xd7   :  { %934 = vmatpush.msra.mxu2 %v2238_v61  ;;  %953 = vmatpush.msra.mxu3 %v2240_v51  ;;  %v3222_v51 = vld [vmem:[#allocation32_spill] sm:$0xff] }
  0xd8   :  { %895 = vmatpush.msra.mxu0 %v3218_v52  ;;  %914 = vmatpush.msra.mxu1 %v3219_v1 }
  0xd9   :  { %935 = vmatpush.msra.mxu2 %v2250_v3  ;;  %954 = vmatpush.msra.mxu3 %v2252_v6  ;;  %v3223_v6 = vld [vmem:[#allocation35_spill] sm:$0xff] }
  0xda   :  { %896 = vmatpush.msra.mxu0 %v3220_v58  ;;  %915 = vmatpush.msra.mxu1 %v3221_v56  ;;  %v3233_v3 = vld [vmem:[#allocation55_spill] sm:$0xff] }
  0xdb   :  { %936 = vmatpush.msra.mxu2 %v2262_v11  ;;  %955 = vmatpush.msra.mxu3 %v2264_v39  ;;  %v3225_v11 = vld [vmem:[#allocation39_spill] sm:$0xff]  ;;  %v3226_v39 = vld [vmem:[#allocation40_spill] sm:$0xff] }
  0xdc   :  { %455 = vadd.xlane.f32.xlu0 %v454_v25  ;;  %897 = vmatpush.msra.mxu0 %v2268_v14  ;;  %v3227_v25 = vld [vmem:[#allocation43_spill] sm:$0xff] }
  0xdd   :  { %916 = vmatpush.msra.mxu1 %v3222_v51  ;;  %937 = vmatpush.msra.mxu2 %v2274_v18  ;;  %v3228_v18 = vld [vmem:[#allocation44_spill] sm:$0xff] }
  0xde   :  { %956 = vmatpush.msra.mxu3 %v2276_v20  ;;  %898 = vmatpush.msra.mxu0 %v3223_v6  ;;  %v3229_v20 = vld [vmem:[#allocation47_spill] sm:$0xff] }
  0xdf   :  { %917 = vmatpush.msra.mxu1 %v3224_v36  ;;  %938 = vmatpush.msra.mxu2 %v2286_v26  ;;  %v3230_v26 = vld [vmem:[#allocation48_spill] sm:$0xff] }
  0xe0   :  { %957 = vmatpush.msra.mxu3 %v2288_v28  ;;  %899 = vmatpush.msra.mxu0 %v3225_v11 }
  0xe1   :  { %918 = vmatpush.msra.mxu1 %v3226_v39  ;;  %939 = vmatpush.msra.mxu2 %v2298_v32 }
  0xe2   :  { %958 = vmatpush.msra.mxu3 %v2300_v34  ;;  %900 = vmatpush.msra.mxu0 %v3227_v25  ;;  %v3231_v34 = vld [vmem:[#allocation51_spill] sm:$0xff] }
  0xe3   :  { %919 = vmatpush.msra.mxu1 %v3228_v18  ;;  %940 = vmatpush.msra.mxu2 %v3196_v2  ;;  %v3232_v2 = vld [vmem:[#allocation54_spill] sm:$0xff] }
  0xe4   :  { %959 = vmatpush.msra.mxu3 %v3197_v48  ;;  %901 = vmatpush.msra.mxu0 %v3229_v20  ;;  %v345_v32 = vpop.f32.mrf.mxu2 }
  0xe5   :  { %920 = vmatpush.msra.mxu1 %v3230_v26  ;;  %941 = vmatpush.msra.mxu2 %v3198_v60 }
  0xe6   :  { %960 = vmatpush.msra.mxu3 %v3199_v59  ;;  %902 = vmatpush.msra.mxu0 %v2328_v50  ;;  %v3234_v59 = vld [vmem:[#allocation18_spill] sm:$0xff] }
  0xe7   :  { %921 = vmatpush.msra.mxu1 %v3231_v34  ;;  %942 = vmatpush.msra.mxu2 %v3200_v41  ;;  %v365_v28 = vpop.f32.mrf.mxu3  ;;  %v1012_v61 = vmul.f32 %v3234_v59, %v3234_v59 }
  0xe8   :  { %961 = vmatpush.msra.mxu3 %v3201_v63  ;;  %903 = vmatpush.msra.mxu0 %v3232_v2  ;;  %v366_v48 = vadd.f32 %v365_v28, %v345_v32  ;;  %v2698_v32 = vld.sshfl [vmem:[#allocation1 + $0x10] sm:$0xff pattern:$0x73625140] }
  0xe9   :  { %922 = vmatpush.msra.mxu1 %v3233_v3  ;;  %943 = vmatpush.msra.mxu2 %v3202_v40  ;;  %v385_v60 = vpop.f32.mrf.mxu0  ;;  %v2704_v40 = vld.sshfl [vmem:[#allocation1 + $0x18] sm:$0xff pattern:$0x73625140] }
  0xea   :  { %962 = vmatpush.msra.mxu3 %v3203_v57  ;;  %904 = vmatpush.msra.mxu0 %v2352_v12  ;;  %v386_v63 = vadd.f32 %v385_v60, %v366_v48  ;;  %v2700_v57 = vld.sshfl [vmem:[#allocation1] sm:$0xff pattern:$0x73625140]  ;;  %v2706_v60 = vld.sshfl [vmem:[#allocation1 + $0x8] sm:$0xff pattern:$0x73625140] }
  0xeb   :  { %923 = vmatpush.msra.mxu1 %v3235_v5  ;;  %944 = vmatpush.msra.mxu2 %v3204_v15  ;;  %1016 = vst [vmem:[#allocation1] ss:$4 sm:$0xff] %v1012_v61 }
  0xec   :  { %963 = vmatpush.msra.mxu3 %v3205_v16  ;;  %905 = vmatpush.msra.mxu0 %v2364_v19  ;;  %v405_v28 = vpop.f32.mrf.mxu1  ;;  %v3239_v16 = vld [vmem:[#allocation70_spill] sm:$0xff] }
  0xed   :  { %924 = vmatpush.msra.mxu1 %v2366_v21  ;;  %945 = vmatpush.msra.mxu2 %v3206_v22  ;;  %v406_v48 = vadd.f32 %v405_v28, %v386_v63  ;;  %v425_v22 = vpop.f32.mrf.mxu2  ;;  %v3237_v63 = vld [vmem:[#allocation20_spill] sm:$0xff]  ;;  %v3238_v28 = vld [vmem:[#allocation69_spill] sm:$0xff] }
  0xee   :  { %964 = vmatpush.msra.mxu3 %v3207_v0  ;;  %906 = vmatpush.msra.mxu0 %v2376_v27  ;;  %v3236_v0 = vld [vmem:[#allocation67_spill] sm:$0xff]  ;;  %v1013_v61 = vmul.f32 %v3237_v63, %v3237_v63 }
  0xef   :  { %925 = vmatpush.msra.mxu1 %v2378_v29  ;;  %946 = vmatpush.msra.mxu2 %v3208_v7  ;;  %v426_v7 = vadd.f32 %v425_v22, %v406_v48  ;;  %v2730_v48 = vld.sshfl [vmem:[#allocation1 + $0x28] sm:$0xff pattern:$0x73625140] }
  0xf0   :  { %965 = vmatpush.msra.mxu3 %v3209_v53  ;;  %907 = vmatpush.msra.mxu0 %v2388_v45  ;;  %v445_v53 = vpop.f32.mrf.mxu3 }
  0xf1   :  { %926 = vmatpush.msra.mxu1 %v2390_v10  ;;  %947 = vmatpush.msra.mxu2 %v3210_v38  ;;  %v446_v22 = vadd.f32 %v445_v53, %v426_v7  ;;  %v3241_v53 = vld [vmem:[#allocation72_spill] sm:$0xff] }
  0xf2   :  { %966 = vmatpush.msra.mxu3 %v3211_v44  ;;  %972 = vmatpush.msrb.mxu0 %v2400_v9 }
  0xf3   :  { %1031 = vmatpush.msrb.mxu2 %v3212_v49  ;;  %927 = vmatpush.msra.mxu1 %v3236_v0  ;;  %v2728_v49 = vld.sshfl [vmem:[#allocation1 + $0x20] sm:$0xff pattern:$0x73625140]  ;;  %v469_v7 = vmul.f32 %v446_v22, %v446_v22 }
  0xf4   :  { %967 = vmatpush.msra.mxu3 %v3213_v42  ;;  %973 = vmatpush.msrb.mxu0 %v3238_v28  ;;  %1018 = vst [vmem:[#allocation1 + $0x20] ss:$4 sm:$0xff] %v1013_v61  ;;  %v3271_v61 = vld [vmem:[#allocation34_spill] sm:$0xff] }
  0xf5   :  { %992 = vmatpush.msrb.mxu1 %v3239_v16  ;;  %1032 = vmatpush.msrb.mxu2 %v3214_v24  ;;  %v3240_v24 = vld [vmem:[#allocation71_spill] sm:$0xff] }
  0xf6   :  { %1051 = vmatpush.msrb.mxu3 %v3215_v55  ;;  %974 = vmatpush.msrb.mxu0 %v2414_v33  ;;  %v448_v55 = vmul.f32 %v446_v22, %v2636_v4 }
  0xf7   :  { %993 = vmatpush.msrb.mxu1 %v2416_v35  ;;  %1033 = vmatpush.msrb.mxu2 %v3216_v17  ;;  %v3242_v17 = vld [vmem:[#allocation73_spill] sm:$0xff] }
  0xf8   :  { %1052 = vmatpush.msrb.mxu3 %v3217_v8  ;;  %975 = vmatpush.msrb.mxu0 %v2435_v31  ;;  %v3243_v8 = vld [vmem:[#allocation74_spill] sm:$0xff]  ;;  %v450_v4 = vsel %vm449_vm0, %v448_v55, 0.0 }
  0xf9   :  { %994 = vmatpush.msrb.mxu1 %v2437_v46  ;;  %1034 = vmatpush.msrb.mxu2 %v3218_v52  ;;  %v3244_v52 = vld [vmem:[#allocation75_spill] sm:$0xff] }
  0xfa   :  { %1053 = vmatpush.msrb.mxu3 %v3219_v1  ;;  %976 = vmatpush.msrb.mxu0 %v2443_v23  ;;  %v3246_v1 = vld [vmem:[#allocation77_spill] sm:$0xff] }
  0xfb   :  { %995 = vmatpush.msrb.mxu1 %v3240_v24  ;;  %1035 = vmatpush.msrb.mxu2 %v3220_v58  ;;  %v470_v58 = vsel %vm449_vm0, %v469_v7, 0.0  ;;  %v3277_v7 = vld [vmem:[#allocation45_spill] sm:$0xff]  ;;  %vm1330_vm0 = vcmask 7168  }
  0xfc   :  { %1054 = vmatpush.msrb.mxu3 %v3221_v56  ;;  %977 = vmatpush.msrb.mxu0 %v3241_v53  ;;  %v3245_v56 = vld [vmem:[#allocation76_spill] sm:$0xff] }
  0xfd   :  { %996 = vmatpush.msrb.mxu1 %v3242_v17  ;;  %1036 = vmatpush.msrb.mxu2 %v2268_v14  ;;  %v3248_v14 = vld [vmem:[#allocation79_spill] sm:$0xff] }
  0xfe   :  { %1055 = vmatpush.msrb.mxu3 %v3222_v51  ;;  %978 = vmatpush.msrb.mxu0 %v3243_v8  ;;  %v3247_v51 = vld [vmem:[#allocation78_spill] sm:$0xff] }
  0xff   :  { %997 = vmatpush.msrb.mxu1 %v3244_v52  ;;  %1037 = vmatpush.msrb.mxu2 %v3223_v6  ;;  %v3249_v6 = vld [vmem:[#allocation80_spill] sm:$0xff] }
 0x100   :  { %1056 = vmatpush.msrb.mxu3 %v3224_v36  ;;  %979 = vmatpush.msrb.mxu0 %v3245_v56  ;;  %v3250_v36 = vld [vmem:[#allocation81_spill] sm:$0xff] }
 0x101   :  { %998 = vmatpush.msrb.mxu1 %v3246_v1  ;;  %1038 = vmatpush.msrb.mxu2 %v3225_v11  ;;  %v3251_v11 = vld [vmem:[#allocation82_spill] sm:$0xff] }
 0x102   :  { %1057 = vmatpush.msrb.mxu3 %v3226_v39  ;;  %471 = vadd.xlane.f32.xlu0 %v470_v58  ;;  %v3252_v39 = vld [vmem:[#allocation83_spill] sm:$0xff]  ;;  %v3280_v58 = vld [vmem:[#allocation49_spill] sm:$0xff] }
 0x103   :  { %451 = vadd.xlane.f32.xlu1 %v450_v4  ;;  %980 = vmatpush.msrb.mxu0 %v3247_v51  ;;  %v3281_v4 = vld [vmem:[#allocation50_spill] sm:$0xff] }
 0x104   :  { %999 = vmatpush.msrb.mxu1 %v3248_v14  ;;  %1039 = vmatpush.msrb.mxu2 %v3227_v25  ;;  %v3267_v25 = vld [vmem:[#allocation21_spill] sm:$0xff] }
 0x105   :  { %1058 = vmatpush.msrb.mxu3 %v3228_v18  ;;  %981 = vmatpush.msrb.mxu0 %v3249_v6  ;;  %v3253_v18 = vld [vmem:[#allocation84_spill] sm:$0xff] }
 0x106   :  { %1000 = vmatpush.msrb.mxu1 %v3250_v36  ;;  %1040 = vmatpush.msrb.mxu2 %v3229_v20  ;;  %v3254_v20 = vld [vmem:[#allocation85_spill] sm:$0xff] }
 0x107   :  { %1059 = vmatpush.msrb.mxu3 %v3230_v26  ;;  %982 = vmatpush.msrb.mxu0 %v3251_v11  ;;  %v3255_v26 = vld [vmem:[#allocation86_spill] sm:$0xff] }
 0x108   :  { %1001 = vmatpush.msrb.mxu1 %v3252_v39  ;;  %1041 = vmatpush.msrb.mxu2 %v2328_v50  ;;  %v3259_v50 = vld [vmem:[#allocation27_spill] sm:$0xff] }
 0x109   :  { %1060 = vmatpush.msrb.mxu3 %v3231_v34  ;;  %948 = vmatmul.f32.vlgmr.msra.gmra.mxu2 %v2698_v32  ;;  %v3268_v32 = vld [vmem:[#allocation22_spill] sm:$0xff] }
 0x10a   :  { %983 = vmatpush.msrb.mxu0 %v2504_v30  ;;  %1002 = vmatpush.msrb.mxu1 %v2506_v43 }
 0x10b   :  { %1042 = vmatpush.msrb.mxu2 %v3232_v2  ;;  %1061 = vmatpush.msrb.mxu3 %v3233_v3  ;;  %v3256_v3 = vld [vmem:[#allocation87_spill] sm:$0xff]  ;;  %v3265_v2 = vld [vmem:[#allocation16_spill] sm:$0xff] }
 0x10c   :  { %908 = vmatmul.f32.vlgmr.msra.gmra.mxu0 %v2700_v57  ;;  %968 = vmatmul.f32.vlgmr.msra.gmra.mxu3 %v2704_v40  ;;  %v3257_v57 = vld [vmem:[#allocation28_spill] sm:$0xff] }
 0x10d   :  { %984 = vmatpush.msrb.mxu0 %v3253_v18  ;;  %1003 = vmatpush.msrb.mxu1 %v3254_v20  ;;  %v1152_v34 = vmul.f32 %v3257_v57, %v3237_v63  ;;  %v3258_v40 = vld [vmem:[#allocation88_spill] sm:$0xff]  ;;  %v3269_v63 = vld [vmem:[#allocation31_spill] sm:$0xff] }
 0x10e   :  { %1043 = vmatpush.msrb.mxu2 %v2352_v12  ;;  %1062 = vmatpush.msrb.mxu3 %v3235_v5  ;;  %v1151_v12 = vmul.f32 %v3259_v50, %v3234_v59  ;;  %v3263_v59 = vld [vmem:[#allocation12_spill] sm:$0xff]  ;;  %v3264_v5 = vld [vmem:[#allocation17_spill] sm:$0xff] }
 0x10f   :  { %928 = vmatmul.f32.vlgmr.msra.gmra.mxu1 %v2706_v60  ;;  %985 = vmatpush.msrb.mxu0 %v2520_v62  ;;  %v65_v60 = vsel %vm63_vm1, %v3268_v32, 0.0  ;;  %v1356_v32 = vld [vmem:[#allocation2 + $0x68] sm:$0xff] }
 0x110   :  { %1004 = vmatpush.msrb.mxu1 %v3255_v26  ;;  %1044 = vmatpush.msrb.mxu2 %v2364_v19  ;;  %v3260_v19 = vld [vmem:[#allocation9_spill] sm:$0xff] }
 0x111   :  { %1063 = vmatpush.msrb.mxu3 %v2366_v21  ;;  %986 = vmatpush.msrb.mxu0 %v3256_v3  ;;  %v1019_v21 = vld.sshfl [vmem:[#allocation1] sm:$0xff pattern:$0x73625140] }
 0x112   :  { %1005 = vmatpush.msrb.mxu1 %v2532_v47  ;;  %1045 = vmatpush.msrb.mxu2 %v2376_v27  ;;  %v2805_v27 = vld.sshfl [vmem:[#allocation1 + $0x20] sm:$0xff pattern:$0x73625140] }
 0x113   :  { %1064 = vmatpush.msrb.mxu3 %v2378_v29  ;;  %987 = vmatpush.msrb.mxu0 %v2538_v54  ;;  %v2813_v29 = vld.sshfl [vmem:[#allocation1 + $0x10] sm:$0xff pattern:$0x73625140] }
 0x114   :  { %1006 = vmatpush.msrb.mxu1 %v2542_v13  ;;  %1046 = vmatpush.msrb.mxu2 %v2388_v45  ;;  %v2815_v45 = vld.sshfl [vmem:[#allocation1 + $0x18] sm:$0xff pattern:$0x73625140] }
 0x115   :  { %1065 = vmatpush.msrb.mxu3 %v2390_v10  ;;  %988 = vmatmul.f32.vlgmr.msrb.gmra.mxu0 %v2728_v49  ;;  %v3261_v10 = vld [vmem:[#allocation8_spill] sm:$0xff]  ;;  %v3274_v49 = vld [vmem:[#allocation38_spill] sm:$0xff] }
 0x116   :  { %1071 = vmatpush.msra.mxu0 %v2212_v37  ;;  %1111 = vmatpush.msra.mxu2 %v2400_v9  ;;  %v2807_v37 = vld.sshfl [vmem:[#allocation1 + $0x28] sm:$0xff pattern:$0x73625140] }
 0x117   :  { %1007 = vmatpush.msrb.mxu1 %v3258_v40  ;;  %1066 = vmatpush.msrb.mxu3 %v3236_v0  ;;  %v3262_v9 = vld [vmem:[#allocation13_spill] sm:$0xff]  ;;  %1157 = vst [vmem:[#allocation1 + $0x20] ss:$4 sm:$0xff] %v1152_v34 }
 0x118   :  { %1008 = vmatmul.f32.vlgmr.msrb.gmra.mxu1 %v2730_v48  ;;  %1072 = vmatpush.msra.mxu0 %v3260_v19  ;;  %v1020_v0 = vld.sshfl [vmem:[#allocation1 + $0x8] sm:$0xff pattern:$0x73625140]  ;;  %v3276_v48 = vld [vmem:[#allocation42_spill] sm:$0xff]  ;;  %v3284_v19 = vld [vmem:[#allocation56_spill] sm:$0xff] }
 0x119   :  { %1091 = vmatpush.msra.mxu1 %v3261_v10  ;;  %1112 = vmatpush.msra.mxu2 %v3238_v28  ;;  %1155 = vst [vmem:[#allocation1] ss:$4 sm:$0xff] %v1151_v12  ;;  %v3273_v28 = vld [vmem:[#allocation23_spill] sm:$0xff]  ;;  %v3282_v34 = vld [vmem:[#allocation25_spill] sm:$0xff] }
 0x11a   :  { %1131 = vmatpush.msra.mxu3 %v3239_v16  ;;  %1073 = vmatpush.msra.mxu0 %v3262_v9  ;;  %v3266_v16 = vld [vmem:[#allocation30_spill] sm:$0xff]  ;;  %v67_v22 = vsel %vm63_vm1, %v3273_v28, 0.0  ;;  %v71_v50 = vsel %vm63_vm1, %v3282_v34, 0.0  ;;  %v3283_v12 = vld [vmem:[#allocation53_spill] sm:$0xff]  ;;  %v1368_v28 = vld [vmem:[#allocation2 + $0x50] sm:$0xff] }
 0x11b   :  { %1092 = vmatpush.msra.mxu1 %v3263_v59  ;;  %1113 = vmatpush.msra.mxu2 %v2414_v33  ;;  %v64_v33 = vsel %vm63_vm1, %v3267_v25, 0.0  ;;  %v3285_v10 = vld [vmem:[#allocation57_spill] sm:$0xff]  ;;  %v3289_v25 = vld [vmem:[#allocation62_spill] sm:$0xff] }
 0x11c   :  { %1132 = vmatpush.msra.mxu3 %v2416_v35  ;;  %1074 = vmatpush.msra.mxu0 %v3264_v5  ;;  %v3270_v35 = vld [vmem:[#allocation33_spill] sm:$0xff]  ;;  %v3287_v5 = vld [vmem:[#allocation60_spill] sm:$0xff] }
 0x11d   :  { %1093 = vmatpush.msra.mxu1 %v3265_v2  ;;  %1114 = vmatpush.msra.mxu2 %v2435_v31  ;;  %v66_v31 = vadd.f32 %v65_v60, %v64_v33  ;;  %v3288_v2 = vld [vmem:[#allocation61_spill] sm:$0xff]  ;;  %v3291_v33 = vld [vmem:[#allocation64_spill] sm:$0xff]  ;;  %v1358_v60 = vld [vmem:[#allocation2 + $0x170] sm:$0xff] }
 0x11e   :  { %1133 = vmatpush.msra.mxu3 %v2437_v46  ;;  %1075 = vmatpush.msra.mxu0 %v3266_v16  ;;  %v3272_v46 = vld [vmem:[#allocation37_spill] sm:$0xff] }
 0x11f   :  { %1094 = vmatpush.msra.mxu1 %v3269_v63  ;;  %1115 = vmatpush.msra.mxu2 %v2443_v23  ;;  %v3275_v23 = vld [vmem:[#allocation41_spill] sm:$0xff] }
 0x120   :  { %1134 = vmatpush.msra.mxu3 %v3240_v24  ;;  %1076 = vmatpush.msra.mxu0 %v3270_v35  ;;  %v68_v24 = vadd.f32 %v67_v22, %v66_v31  ;;  %v1360_v63 = vld [vmem:[#allocation2 + $0x60] sm:$0xff]  ;;  %v1363_v35 = vld [vmem:[#allocation2 + $0x1f0] sm:$0xff]  ;;  %v1369_v22 = vld [vmem:[#allocation2 + $0xd8] sm:$0xff] }
 0x121   :  { %1095 = vmatpush.msra.mxu1 %v3271_v61  ;;  %1116 = vmatpush.msra.mxu2 %v3241_v53  ;;  %v3278_v53 = vld [vmem:[#allocation24_spill] sm:$0xff]  ;;  %v1366_v31 = vld [vmem:[#allocation2 + $0x160] sm:$0xff] }
 0x122   :  { %1135 = vmatpush.msra.mxu3 %v3242_v17  ;;  %1077 = vmatpush.msra.mxu0 %v3272_v46  ;;  %v69_v55 = vsel %vm63_vm1, %v3278_v53, 0.0  ;;  %v3279_v17 = vld [vmem:[#allocation46_spill] sm:$0xff]  ;;  %v1364_v61 = vld [vmem:[#allocation2 + $0x58] sm:$0xff]  ;;  %v1381_v34 = vld [vmem:[#allocation2 + $0xc0] sm:$0xff] }
 0x123   :  { %1096 = vmatpush.msra.mxu1 %v3274_v49  ;;  %1117 = vmatpush.msra.mxu2 %v3243_v8  ;;  %v70_v57 = vadd.f32 %v69_v55, %v68_v24  ;;  %v1367_v46 = vld [vmem:[#allocation2 + $0x1e8] sm:$0xff]  ;;  %v1370_v49 = vld [vmem:[#allocation2 + $0x158] sm:$0xff]  ;;  %v1373_v24 = vld [vmem:[#allocation2 + $0xd0] sm:$0xff] }
 0x124   :  { %1136 = vmatpush.msra.mxu3 %v3244_v52  ;;  %1078 = vmatpush.msra.mxu0 %v3275_v23  ;;  %v1371_v23 = vld [vmem:[#allocation2 + $0x1e0] sm:$0xff]  ;;  %v1375_v53 = vld [vmem:[#allocation2 + $0x1d8] sm:$0xff] }
 0x125   :  { %1097 = vmatpush.msra.mxu1 %v3276_v48  ;;  %1118 = vmatpush.msra.mxu2 %v3245_v56  ;;  %v72_v9 = vadd.f32 %v71_v50, %v70_v57  ;;  %v1372_v48 = vld [vmem:[#allocation2 + $0x48] sm:$0xff]  ;;  %v1376_v55 = vld [vmem:[#allocation2 + $0x40] sm:$0xff]  ;;  %v1380_v57 = vld [vmem:[#allocation2 + $0x38] sm:$0xff] }
 0x126   :  { %1137 = vmatpush.msra.mxu3 %v3246_v1  ;;  %1079 = vmatpush.msra.mxu0 %v3277_v7  ;;  %v1374_v7 = vld [vmem:[#allocation2 + $0x150] sm:$0xff]  ;;  %v1382_v50 = vld [vmem:[#allocation2 + $0x140] sm:$0xff] }
 0x127   :  { %1098 = vmatpush.msra.mxu1 %v3279_v17  ;;  %1119 = vmatpush.msra.mxu2 %v3247_v51  ;;  %v1377_v17 = vld [vmem:[#allocation2 + $0xc8] sm:$0xff] }
 0x128   :  { %1138 = vmatpush.msra.mxu3 %v3248_v14  ;;  %1080 = vmatpush.msra.mxu0 %v3280_v58  ;;  %v1378_v58 = vld [vmem:[#allocation2 + $0x148] sm:$0xff] }
 0x129   :  { %1099 = vmatpush.msra.mxu1 %v3281_v4  ;;  %1120 = vmatpush.msra.mxu2 %v3249_v6  ;;  %v1379_v4 = vld [vmem:[#allocation2 + $0x1d0] sm:$0xff] }
 0x12a   :  { %1139 = vmatpush.msra.mxu3 %v3250_v36  ;;  %1081 = vmatpush.msra.mxu0 %v3200_v41  ;;  %v3286_v41 = vld [vmem:[#allocation26_spill] sm:$0xff] }
 0x12b   :  { %1100 = vmatpush.msra.mxu1 %v3283_v12  ;;  %1121 = vmatpush.msra.mxu2 %v3251_v11  ;;  %v73_v59 = vsel %vm63_vm1, %v3286_v41, 0.0  ;;  %v1383_v12 = vld [vmem:[#allocation2 + $0x1c8] sm:$0xff]  ;;  %v1387_v41 = vld [vmem:[#allocation2 + $0x1c0] sm:$0xff]  ;;  %vm1332_vm1 = vcmask 9216  }
 0x12c   :  { %1140 = vmatpush.msra.mxu3 %v3252_v39  ;;  %1082 = vmatpush.msra.mxu0 %v3284_v19  ;;  %v74_v16 = vadd.f32 %v73_v59, %v72_v9  ;;  %v1384_v19 = vld [vmem:[#allocation2 + $0x30] sm:$0xff]  ;;  %v1386_v9 = vld [vmem:[#allocation2 + $0x138] sm:$0xff]  ;;  %v1388_v59 = vld [vmem:[#allocation2 + $0x28] sm:$0xff] }
 0x12d   :  { %1101 = vmatpush.msra.mxu1 %v3285_v10  ;;  %1122 = vmatpush.msra.mxu2 %v2504_v30  ;;  %v1385_v10 = vld [vmem:[#allocation2 + $0xb8] sm:$0xff] }
 0x12e   :  { %1141 = vmatpush.msra.mxu3 %v2506_v43  ;;  %1047 = vmatmul.f32.vlgmr.msrb.gmra.mxu2 %v1019_v21  ;;  %v3290_v21 = vld [vmem:[#allocation63_spill] sm:$0xff] }
 0x12f   :  { %1083 = vmatpush.msra.mxu0 %v3204_v15  ;;  %1102 = vmatpush.msra.mxu1 %v3287_v5  ;;  %v1352_v15 = vld [vmem:[#allocation2 + $0x78] sm:$0xff]  ;;  %v1389_v5 = vld [vmem:[#allocation2 + $0xb0] sm:$0xff] }
 0x130   :  { %1123 = vmatpush.msra.mxu2 %v3253_v18  ;;  %1142 = vmatpush.msra.mxu3 %v3254_v20 }
 0x131   :  { %1067 = vmatmul.f32.vlgmr.msrb.gmra.mxu3 %v1020_v0  ;;  %1084 = vmatpush.msra.mxu0 %v3288_v2  ;;  %v1353_v0 = vld [vmem:[#allocation2 + $0x70] sm:$0xff] }
 0x132   :  { %1103 = vmatpush.msra.mxu1 %v3289_v25  ;;  %1124 = vmatpush.msra.mxu2 %v2520_v62  ;;  %v1390_v2 = vld [vmem:[#allocation2 + $0x130] sm:$0xff]  ;;  %v1392_v25 = vld [vmem:[#allocation2 + $0x20] sm:$0xff] }
 0x133   :  { %1143 = vmatpush.msra.mxu3 %v3255_v26  ;;  %1085 = vmatpush.msra.mxu0 %v3290_v21  ;;  %v1393_v21 = vld [vmem:[#allocation2 + $0xa8] sm:$0xff] }
 0x134   :  { %1104 = vmatpush.msra.mxu1 %v3291_v33  ;;  %1125 = vmatpush.msra.mxu2 %v3256_v3  ;;  %v1394_v33 = vld [vmem:[#allocation2 + $0x128] sm:$0xff] }
 0x135   :  { %1144 = vmatpush.msra.mxu3 %v2532_v47  ;;  %75 = vadd.xlane.f32.xlu2 %v74_v16  ;;  %v1391_v16 = vld [vmem:[#allocation2 + $0x1b8] sm:$0xff] }
 0x136   :  { %1086 = vmatpush.msra.mxu0 %v3210_v38  ;;  %1105 = vmatpush.msra.mxu1 %v3211_v44  ;;  %v1354_v38 = vld [vmem:[#allocation2 + $0xf8] sm:$0xff] }
 0x137   :  { %1126 = vmatpush.msra.mxu2 %v2538_v54  ;;  %1145 = vmatpush.msra.mxu3 %v2542_v13  ;;  %v1355_v44 = vld [vmem:[#allocation2 + $0x178] sm:$0xff] }
 0x138   :  { %1127 = vmatmul.f32.vlgmr.msra.gmra.mxu2 %v2805_v27  ;;  %1170 = vmatpush.msrb.mxu0 %v1352_v15  ;;  %v1357_v27 = vld [vmem:[#allocation2 + $0xf0] sm:$0xff] }
 0x139   :  { %1106 = vmatpush.msra.mxu1 %v3213_v42  ;;  %1146 = vmatpush.msra.mxu3 %v3258_v40  ;;  %v1359_v42 = vld [vmem:[#allocation2 + $0x1f8] sm:$0xff]  ;;  %v1395_v15 = vld [vmem:[#allocation2 + $0x1b0] sm:$0xff] }
 0x13a   :  { %1087 = vmatmul.f32.vlgmr.msra.gmra.mxu0 %v2813_v29  ;;  %1147 = vmatmul.f32.vlgmr.msra.gmra.mxu3 %v2807_v37  ;;  %v1361_v29 = vld [vmem:[#allocation2 + $0xe8] sm:$0xff] }
 0x13b   :  { %1171 = vmatpush.msrb.mxu0 %v1353_v0  ;;  %1190 = vmatpush.msrb.mxu1 %v1354_v38  ;;  %v1362_v37 = vld [vmem:[#allocation2 + $0x168] sm:$0xff]  ;;  %v1396_v0 = vld [vmem:[#allocation2 + $0x18] sm:$0xff]  ;;  %v1397_v38 = vld [vmem:[#allocation2 + $0xa0] sm:$0xff] }
 0x13c   :  { %1107 = vmatmul.f32.vlgmr.msra.gmra.mxu1 %v2815_v45  ;;  %1210 = vmatpush.msrb.mxu2 %v1355_v44  ;;  %v1365_v45 = vld [vmem:[#allocation2 + $0xe0] sm:$0xff] }
 0x13d   :  { %1172 = vmatpush.msrb.mxu0 %v1356_v32  ;;  %1191 = vmatpush.msrb.mxu1 %v1357_v27  ;;  %v1398_v44 = vld [vmem:[#allocation2 + $0x120] sm:$0xff]  ;;  %v1399_v32 = vld [vmem:[#allocation2 + $0x1a8] sm:$0xff]  ;;  %v1400_v27 = vld [vmem:[#allocation2 + $0x10] sm:$0xff] }
 0x13e   :  { %1211 = vmatpush.msrb.mxu2 %v1358_v60  ;;  %1230 = vmatpush.msrb.mxu3 %v1359_v42  ;;  %v1401_v60 = vld [vmem:[#allocation2 + $0x98] sm:$0xff] }
 0x13f   :  { %1173 = vmatpush.msrb.mxu0 %v1360_v63  ;;  %1192 = vmatpush.msrb.mxu1 %v1361_v29  ;;  %v1402_v42 = vld [vmem:[#allocation2 + $0x118] sm:$0xff]  ;;  %v1403_v63 = vld [vmem:[#allocation2 + $0x1a0] sm:$0xff]  ;;  %v1404_v29 = vld [vmem:[#allocation2 + $0x8] sm:$0xff] }
 0x140   :  { %1212 = vmatpush.msrb.mxu2 %v1362_v37  ;;  %1231 = vmatpush.msrb.mxu3 %v1363_v35  ;;  %v1405_v37 = vld [vmem:[#allocation2 + $0x90] sm:$0xff] }
 0x141   :  { %1174 = vmatpush.msrb.mxu0 %v1364_v61  ;;  %1193 = vmatpush.msrb.mxu1 %v1365_v45  ;;  %v1406_v35 = vld [vmem:[#allocation2 + $0x110] sm:$0xff]  ;;  %v1407_v61 = vld [vmem:[#allocation2 + $0x198] sm:$0xff]  ;;  %v1408_v45 = vld [vmem:[#allocation2] sm:$0xff] }
 0x142   :  { %1213 = vmatpush.msrb.mxu2 %v1366_v31  ;;  %1232 = vmatpush.msrb.mxu3 %v1367_v46  ;;  %v1409_v31 = vld [vmem:[#allocation2 + $0x88] sm:$0xff]  ;;  %v1410_v46 = vld [vmem:[#allocation2 + $0x278] sm:$0xff] }
 0x143   :  { %1175 = vmatpush.msrb.mxu0 %v1368_v28  ;;  %1194 = vmatpush.msrb.mxu1 %v1369_v22  ;;  %v1411_v28 = vld [vmem:[#allocation2 + $0x108] sm:$0xff]  ;;  %v1412_v22 = vld [vmem:[#allocation2 + $0x80] sm:$0xff] }
 0x144   :  { %1214 = vmatpush.msrb.mxu2 %v1370_v49  ;;  %1233 = vmatpush.msrb.mxu3 %v1371_v23  ;;  %v1413_v49 = vld [vmem:[#allocation2 + $0x190] sm:$0xff] }
 0x145   :  { %1176 = vmatpush.msrb.mxu0 %v1372_v48  ;;  %1195 = vmatpush.msrb.mxu1 %v1373_v24  ;;  %v1414_v23 = vld [vmem:[#allocation2 + $0x270] sm:$0xff]  ;;  %v1415_v48 = vld [vmem:[#allocation2 + $0x2f8] sm:$0xff]  ;;  %v1160_v24 = vld.sshfl [vmem:[#allocation1 + $0x10] sm:$0xff pattern:$0x73625140] }
 0x146   :  { %1215 = vmatpush.msrb.mxu2 %v1374_v7  ;;  %1234 = vmatpush.msrb.mxu3 %v1375_v53  ;;  %v1416_v7 = vld [vmem:[#allocation2 + $0x100] sm:$0xff]  ;;  %v1417_v53 = vld [vmem:[#allocation2 + $0x188] sm:$0xff] }
 0x147   :  { %1177 = vmatpush.msrb.mxu0 %v1376_v55  ;;  %1196 = vmatpush.msrb.mxu1 %v1377_v17  ;;  %v1418_v55 = vld [vmem:[#allocation2 + $0x268] sm:$0xff]  ;;  %v1419_v17 = vld [vmem:[#allocation2 + $0x2f0] sm:$0xff] }
 0x148   :  { %1216 = vmatpush.msrb.mxu2 %v1378_v58  ;;  %1235 = vmatpush.msrb.mxu3 %v1379_v4  ;;  %v1161_v58 = vld.sshfl [vmem:[#allocation1 + $0x18] sm:$0xff pattern:$0x73625140]  ;;  %v1158_v4 = vld.sshfl [vmem:[#allocation1] sm:$0xff pattern:$0x73625140] }
 0x149   :  { %1178 = vmatpush.msrb.mxu0 %v1380_v57  ;;  %1197 = vmatpush.msrb.mxu1 %v1381_v34  ;;  %v1420_v57 = vld [vmem:[#allocation2 + $0x180] sm:$0xff] }
 0x14a   :  { %1217 = vmatpush.msrb.mxu2 %v1382_v50  ;;  %1236 = vmatpush.msrb.mxu3 %v1383_v12  ;;  %v1421_v34 = vld [vmem:[#allocation2 + $0x260] sm:$0xff]  ;;  %v1422_v50 = vld [vmem:[#allocation2 + $0x2e8] sm:$0xff] }
 0x14b   :  { %1179 = vmatpush.msrb.mxu0 %v1384_v19  ;;  %1198 = vmatpush.msrb.mxu1 %v1385_v10  ;;  %v1159_v12 = vld.sshfl [vmem:[#allocation1 + $0x8] sm:$0xff pattern:$0x73625140]  ;;  %v1423_v19 = vld [vmem:[#allocation2 + $0x258] sm:$0xff] }
 0x14c   :  { %1218 = vmatpush.msrb.mxu2 %v1386_v9  ;;  %1237 = vmatpush.msrb.mxu3 %v1387_v41  ;;  %v1424_v10 = vld [vmem:[#allocation2 + $0x2e0] sm:$0xff]  ;;  %v1425_v9 = vld [vmem:[#allocation2 + $0x250] sm:$0xff]  ;;  %v1426_v41 = vld [vmem:[#allocation2 + $0x2d8] sm:$0xff] }
 0x14d   :  { %1180 = vmatpush.msrb.mxu0 %v1388_v59  ;;  %1199 = vmatpush.msrb.mxu1 %v1389_v5 }
 0x14e   :  { %1219 = vmatpush.msrb.mxu2 %v1390_v2  ;;  %1238 = vmatpush.msrb.mxu3 %v1391_v16 }
 0x14f   :  { %1181 = vmatpush.msrb.mxu0 %v1392_v25  ;;  %1200 = vmatpush.msrb.mxu1 %v1393_v21 }
 0x150   :  { %1220 = vmatpush.msrb.mxu2 %v1394_v33  ;;  %1239 = vmatpush.msrb.mxu3 %v1395_v15 }
 0x151   :  { %1182 = vmatpush.msrb.mxu0 %v1396_v0  ;;  %1201 = vmatpush.msrb.mxu1 %v1397_v38 }
 0x152   :  { %1221 = vmatpush.msrb.mxu2 %v1398_v44  ;;  %1240 = vmatpush.msrb.mxu3 %v1399_v32 }
 0x153   :  { %1183 = vmatpush.msrb.mxu0 %v1400_v27  ;;  %1202 = vmatpush.msrb.mxu1 %v1401_v60 }
 0x154   :  { %1222 = vmatpush.msrb.mxu2 %v1402_v42  ;;  %1241 = vmatpush.msrb.mxu3 %v1403_v63 }
 0x155   :  { %1184 = vmatpush.msrb.mxu0 %v1404_v29  ;;  %1203 = vmatpush.msrb.mxu1 %v1405_v37 }
 0x156   :  { %1223 = vmatpush.msrb.mxu2 %v1406_v35  ;;  %1242 = vmatpush.msrb.mxu3 %v1407_v61 }
 0x157   :  { %1185 = vmatpush.msrb.mxu0 %v1408_v45  ;;  %1204 = vmatpush.msrb.mxu1 %v1409_v31 }
 0x158   :  { %1224 = vmatpush.msrb.mxu2 %v1411_v28  ;;  %1243 = vmatpush.msrb.mxu3 %v1413_v49 }
 0x159   :  { %1250 = vmatpush.msra.mxu0 %v1410_v46  ;;  %1205 = vmatpush.msrb.mxu1 %v1412_v22 }
 0x15a   :  { %1225 = vmatpush.msrb.mxu2 %v1416_v7  ;;  %1244 = vmatpush.msrb.mxu3 %v1417_v53 }
 0x15b   :  { %1251 = vmatpush.msra.mxu0 %v1414_v23  ;;  %1270 = vmatpush.msra.mxu1 %v1415_v48 }
 0x15c   :  { %1226 = vmatmul.f32.vlgmr.msrb.gmra.mxu2 %v1160_v24  ;;  %1245 = vmatpush.msrb.mxu3 %v1420_v57 }
 0x15d   :  { %1252 = vmatpush.msra.mxu0 %v1418_v55  ;;  %1271 = vmatpush.msra.mxu1 %v1419_v17 }
 0x15e   :  { %1246 = vmatmul.f32.vlgmr.msrb.gmra.mxu3 %v1161_v58  ;;  %1186 = vmatmul.f32.vlgmr.msrb.gmra.mxu0 %v1158_v4 }
 0x15f   :  { %1253 = vmatpush.msra.mxu0 %v1421_v34  ;;  %1272 = vmatpush.msra.mxu1 %v1422_v50 }
 0x160   :  { %1206 = vmatmul.f32.vlgmr.msrb.gmra.mxu1 %v1159_v12 }
 0x161   :  { %1254 = vmatpush.msra.mxu0 %v1423_v19  ;;  %1273 = vmatpush.msra.mxu1 %v1424_v10 }
 0x163   :  { %1255 = vmatpush.msra.mxu0 %v1425_v9  ;;  %1274 = vmatpush.msra.mxu1 %v1426_v41 }
 0x165   :  { %1256 = vmatpush.msra.mxu0 %v3243_v8  ;;  %1275 = vmatpush.msra.mxu1 %v3244_v52  ;;  %v1162_v8 = vld.sshfl [vmem:[#allocation1 + $0x20] sm:$0xff pattern:$0x73625140]  ;;  %v655_v52 = vpop.f32.mrf.mxu1 }
 0x167   :  { %1257 = vmatpush.msra.mxu0 %v3245_v56  ;;  %1276 = vmatpush.msra.mxu1 %v3246_v1  ;;  %v695_v56 = vpop.f32.mrf.mxu3 }
 0x169   :  { %1258 = vmatpush.msra.mxu0 %v3247_v51  ;;  %1277 = vmatpush.msra.mxu1 %v3248_v14 }
 0x16b   :  { %1259 = vmatpush.msra.mxu0 %v3249_v6  ;;  %1278 = vmatpush.msra.mxu1 %v3250_v36 }
 0x16d   :  { %1260 = vmatpush.msra.mxu0 %v3251_v11  ;;  %1279 = vmatpush.msra.mxu1 %v3252_v39  ;;  %v735_v51 = vpop.f32.mrf.mxu1 }
 0x16f   :  { %1261 = vmatpush.msra.mxu0 %v2504_v30  ;;  %1280 = vmatpush.msra.mxu1 %v2506_v43  ;;  %v1163_v30 = vld.sshfl [vmem:[#allocation1 + $0x28] sm:$0xff pattern:$0x73625140]  ;;  %v635_v43 = vpop.f32.mrf.mxu0  ;;  %v790_v14 = vpop.f32.mrf.mxu3 }
 0x170   :  { %v656_v2 = vadd.f32 %v655_v52, %v635_v43 }
 0x171   :  { %1262 = vmatpush.msra.mxu0 %v3253_v18  ;;  %1281 = vmatpush.msra.mxu1 %v3254_v20 }
 0x173   :  { %1263 = vmatpush.msra.mxu0 %v2520_v62  ;;  %1282 = vmatpush.msra.mxu1 %v3255_v26  ;;  %v675_v62 = vpop.f32.mrf.mxu2 }
 0x174   :  { %v676_v15 = vadd.f32 %v675_v62, %v656_v2 }
 0x175   :  { %1264 = vmatpush.msra.mxu0 %v3256_v3  ;;  %1283 = vmatpush.msra.mxu1 %v2532_v47  ;;  %v830_v47 = vpop.f32.mrf.mxu1 }
 0x176   :  { %v696_v27 = vadd.f32 %v695_v56, %v676_v15 }
 0x177   :  { %1265 = vmatpush.msra.mxu0 %v2538_v54  ;;  %1284 = vmatpush.msra.mxu1 %v2542_v13  ;;  %v715_v1 = vpop.f32.mrf.mxu0  ;;  %v870_v11 = vpop.f32.mrf.mxu3 }
 0x178   :  { %1266 = vmatmul.f32.vlgmr.msra.gmra.mxu0 %v1162_v8  ;;  %v716_v37 = vadd.f32 %v715_v1, %v696_v27 }
 0x179   :  { %1285 = vmatpush.msra.mxu1 %v3258_v40 }
 0x17a   :  { %1286 = vmatmul.f32.vlgmr.msra.gmra.mxu1 %v1163_v30  ;;  %v736_v46 = vadd.f32 %v735_v51, %v716_v37 }
 0x17b   :  { %v770_v6 = vpop.f32.mrf.mxu2 }
 0x17c   :  { %v791_v59 = vadd.f32 %v790_v14, %v770_v6  ;;  %v1290_v23 = vmul.f32 %v736_v46, %v736_v46  ;;  %v1296_v62 = vmul.f32 2.0, %v736_v46 }
 0x17f   :  { %v810_v36 = vpop.f32.mrf.mxu0 }
 0x180   :  { %v811_v21 = vadd.f32 %v810_v36, %v791_v59 }
 0x182   :  { %v831_v44 = vadd.f32 %v830_v47, %v811_v21 }
 0x183   :  { %v850_v39 = vpop.f32.mrf.mxu2 }
 0x184   :  { %v851_v63 = vadd.f32 %v850_v39, %v831_v44 }
 0x186   :  { %v871_v45 = vadd.f32 %v870_v11, %v851_v63 }
 0x188   :  { %v1292_v49 = vmul.f32 %v871_v45, %v871_v45  ;;  %v1294_v51 = vmul.f32 %v871_v45, %v736_v46  ;;  %v1297_v14 = vmul.f32 %v1296_v62, %v871_v45 }
 0x189   :  { %v909_v54 = vpop.f32.mrf.mxu0 }
 0x18a   :  { %v1302_v53 = vadd.f32 %v1292_v49, %v1290_v23 }
 0x18c   :  { %v929_v18 = vpop.f32.mrf.mxu1  ;;  %v949_v20 = vpop.f32.mrf.mxu2  ;;  %v1303_v17 = vadd.f32 0.0004, %v1302_v53 }
 0x18d   :  { %v930_v33 = vadd.f32 %v929_v18, %v909_v54  ;;  %v1298_v54 = vadd.f32 0.0004, %v1297_v14 }
 0x18f   :  { %v969_v13 = vpop.f32.mrf.mxu3  ;;  %v950_v32 = vadd.f32 %v949_v20, %v930_v33 }
 0x191   :  { %v970_v29 = vadd.f32 %v969_v13, %v950_v32 }
 0x192   :  { %v989_v26 = vpop.f32.mrf.mxu0 }
 0x193   :  { %v990_v31 = vadd.f32 %v989_v26, %v970_v29 }
 0x195   :  { %v1009_v3 = vpop.f32.mrf.mxu1 }
 0x196   :  { %v1010_v22 = vadd.f32 %v1009_v3, %v990_v31 }
 0x198   :  { %v1291_v24 = vsub.f32 %v1010_v22, %v1290_v23 }
 0x1b1   :  { %v1048_v5 = vpop.f32.mrf.mxu2 }
 0x1b4   :  { %v1068_v40 = vpop.f32.mrf.mxu3 }
 0x1b5   :  { %v1069_v16 = vadd.f32 %v1068_v40, %v1048_v5  ;;  %v456_v5 = vpop.xlane.xlu0 %455 }
 0x1b6   :  { %vm464_vm9 = vcmp.eq.f32.partialorder %v456_v5, inf  ;;  %v467_v45 = vand.u32 2147483648, %v456_v5  ;;  %vm466_vm10 = vcmp.eq.f32.partialorder %v456_v5, 0.0 }
 0x1b7   :  { %v1088_v25 = vpop.f32.mrf.mxu0 }
 0x1b8   :  { %v1089_v0 = vadd.f32 %v1088_v25, %v1069_v16 }
 0x1b9   :  { %v1108_v38 = vpop.f32.mrf.mxu1 }
 0x1ba   :  { %v1109_v60 = vadd.f32 %v1108_v38, %v1089_v0 }
 0x1bb   :  { %v1128_v42 = vpop.f32.mrf.mxu2 }
 0x1bc   :  { %v1129_v35 = vadd.f32 %v1128_v42, %v1109_v60 }
 0x1bd   :  { %v1148_v61 = vpop.f32.mrf.mxu3  ;;  %v472_v2 = vpop.xlane.xlu0 %471 }
 0x1be   :  { %v1149_v28 = vadd.f32 %v1148_v61, %v1129_v35  ;;  %vm480_vm7 = vcmp.eq.f32.partialorder %v472_v2, inf  ;;  %v483_v37 = vand.u32 2147483648, %v472_v2  ;;  %vm482_vm8 = vcmp.eq.f32.partialorder %v472_v2, 0.0 }
 0x1c0   :  { %v1293_v48 = vsub.f32 %v1149_v28, %v1292_v49 }
 0x1c2   :  { %v1304_v7 = vadd.f32 %v1293_v48, %v1291_v24 }
 0x1c4   :  { %v1305_v55 = vadd.f32 0.0036, %v1304_v7 }
 0x1c6   :  { %v1306_v58 = vmul.f32 %v1305_v55, %v1303_v17 }
 0x1c8   :  { %1344 = vrcp.f32 %v1306_v58  ;;  %v1318_v47 = vand.u32 2147483648, %v1306_v58  ;;  %vm1312_vm3 = vweird.f32 %v1306_v58  ;;  %v1316_v39 = vand.u32 2147483647, %v1306_v58 }
 0x1c9   :  { %1346 = vrsqrt.f32 %v472_v2 }
 0x1ca   :  { %v1319_v20 = vor.u32 1.1754944e-38, %v1318_v47  ;;  %vm1317_vm5 = vcmp.eq.f32.partialorder %v1316_v39, 8.507059e+37  ;;  %1348 = vrsqrt.f32 %v456_v5 }
 0x1ce   :  { %v1345_v34 = vpop.eup %1344 }
 0x1cf   :  { %v1308_v19 = vmul.f32 %v1345_v34, %v1306_v58  ;;  %vm1313_vm2 = vweird.f32 %v1345_v34  ;;  %v1347_v16 = vpop.eup %1346 }
 0x1d0   :  { %vm1314_vm4 = vmor %vm1312_vm3, %vm1313_vm2  ;;  %v1349_v25 = vpop.eup %1348  ;;  %v474_v21 = vmul.f32 %v1347_v16, %v472_v2 }
 0x1d1   :  { %v1309_v41 = vsub.f32 1.0, %v1308_v19  ;;  %v458_v33 = vmul.f32 %v1349_v25, %v456_v5 }
 0x1d2   :  { %v475_v15 = vmul.f32 %v1347_v16, %v474_v21 }
 0x1d3   :  { %v1310_v52 = vmul.f32 %v1345_v34, %v1309_v41  ;;  %v459_v0 = vmul.f32 %v1349_v25, %v458_v33 }
 0x1d4   :  { %v476_v38 = vmul.f32 0.5, %v475_v15 }
 0x1d5   :  { %v1311_v36 = vadd.f32 %v1345_v34, %v1310_v52  ;;  %v460_v44 = vmul.f32 0.5, %v459_v0 }
 0x1d6   :  { %v477_v32 = vsub.f32 1.5, %v476_v38 }
 0x1d7   :  { %v1315_v13 = vsel %vm1314_vm4, %v1345_v34, %v1311_v36  ;;  %v461_v27 = vsub.f32 1.5, %v460_v44 }
 0x1d8   :  { %v1320_v3 = vsel %vm1317_vm5, %v1319_v20, %v1315_v13  ;;  %v478_v60 = vmul.f32 %v1347_v16, %v477_v32 }
 0x1d9   :  { %v462_v42 = vmul.f32 %v1349_v25, %v461_v27 }
 0x1da   :  { %v479_v63 = vmul.f32 %v478_v60, %v472_v2 }
 0x1db   :  { %v1187_v4 = vpop.f32.mrf.mxu0  ;;  %v463_v29 = vmul.f32 %v462_v42, %v456_v5 }
 0x1dc   :  { %v481_v35 = vsel %vm480_vm7, %v472_v2, %v479_v63 }
 0x1dd   :  { %v1207_v57 = vpop.f32.mrf.mxu1  ;;  %v465_v61 = vsel %vm464_vm9, %v456_v5, %v463_v29  ;;  %v484_v31 = vsel %vm482_vm8, %v483_v37, %v481_v35 }
 0x1de   :  { %v1208_v50 = vadd.f32 %v1207_v57, %v1187_v4  ;;  %v468_v46 = vsel %vm466_vm10, %v467_v45, %v465_v61  ;;  %v452_v57 = vpop.xlane.xlu1 %451 }
 0x1df   :  { %v1227_v12 = vpop.f32.mrf.mxu2  ;;  %v485_v28 = vmul.f32 %v484_v31, %v468_v46 }
 0x1e0   :  { %v1228_v10 = vadd.f32 %v1227_v12, %v1208_v50  ;;  %v76_v50 = vpop.xlane.xlu2 %75 }
 0x1e1   :  { %v1247_v9 = vpop.f32.mrf.mxu3  ;;  %v486_v22 = vmax.f32 %v485_v28, 1e-08  ;;  %v77_v19 = vmul.f32 0.0013020834, %v76_v50 }
 0x1e2   :  { %v1248_v8 = vadd.f32 %v1247_v9, %v1228_v10  ;;  %v1456_v9 = vmov 0.0  }
 0x1e3   :  { %1350 = vrcp.f32 %v486_v22  ;;  %v498_v53 = vand.u32 2147483648, %v486_v22  ;;  %vm492_vm12 = vweird.f32 %v486_v22  ;;  %v496_v55 = vand.u32 2147483647, %v486_v22 }
 0x1e5   :  { %v499_v58 = vor.u32 1.1754944e-38, %v498_v53  ;;  %vm497_vm14 = vcmp.eq.f32.partialorder %v496_v55, 8.507059e+37 }
 0x1e9   :  { %v1351_v49 = vpop.eup %1350 }
 0x1ea   :  { %v488_v23 = vmul.f32 %v1351_v49, %v486_v22  ;;  %vm493_vm11 = vweird.f32 %v1351_v49 }
 0x1eb   :  { %vm494_vm13 = vmor %vm492_vm12, %vm493_vm11 }
 0x1ec   :  { %v489_v48 = vsub.f32 1.0, %v488_v23 }
 0x1ee   :  { %v490_v24 = vmul.f32 %v1351_v49, %v489_v48 }
 0x1f0   :  { %v491_v7 = vadd.f32 %v1351_v49, %v490_v24 }
 0x1f2   :  { %v495_v17 = vsel %vm494_vm13, %v1351_v49, %v491_v7 }
 0x1f3   :  { %v500_v4 = vsel %vm497_vm14, %v499_v58, %v495_v17 }
 0x1f4   :  { %v501_v34 = vmul.f32 %v500_v4, %v452_v57 }
 0x1f5   :  { %v1267_v30 = vpop.f32.mrf.mxu0 }
 0x1f6   :  { %v1268_v43 = vadd.f32 %v1267_v30, %v1248_v8  ;;  %vm502_vm15 = vcmp.gt.f32.partialorder %v501_v34, 0.8 }
 0x1f7   :  { %v1287_v56 = vpop.f32.mrf.mxu1  ;;  %v1339_v41 = vsel %vm502_vm15, 1.0, %v1456_v9 }
 0x1f8   :  { %v1288_v1 = vadd.f32 %v1287_v56, %v1268_v43  ;;  %v1327_v30 = vmul.f32 %v1339_v41, %v77_v19 }
 0x1fa   :  { %v1295_v6 = vsub.f32 %v1288_v1, %v1294_v51 }
 0x1fc   :  { %v1299_v11 = vmul.f32 2.0, %v1295_v6 }
 0x1fe   :  { %v1300_v18 = vadd.f32 0.0036, %v1299_v11 }
 0x200   :  { %v1301_v26 = vmul.f32 %v1300_v18, %v1298_v54 }
 0x202   :  { %v1321_v40 = vmul.f32 %v1320_v3, %v1301_v26 }
 0x204   :  { %v1323_v59 = vsel %vm1322_vm6, %v1321_v40, 0.0 }
 0x205   :  { %1324 = vadd.xlane.f32.xlu1 %v1323_v59 }
 0x278   :  { %v1325_v12 = vpop.xlane.xlu1 %1324 }
 0x279   :  { %v1326_v10 = vmul.f32 0.009259259, %v1325_v12 }
 0x27b   :  { %v1328_v8 = vsub.f32 1.0, %v1326_v10 }
 0x27d   :  { %v1329_v43 = vmul.f32 %v1339_v41, %v1328_v8 }
 0x27f   :  { %v1331_v52 = vsel %vm1330_vm0, %v1327_v30, %v1329_v43 }
 0x280   :  { %1333 = vst.msk [vmem:[%s2917_s5] sm:$0x3] %vm1332_vm1, %v1331_v52 }
 0x281   :  { %1338 = vsyncpa [#allocation3], 1 }

</bundles_post_ra>
